<compile_context>
chip_gen: v5e
topology: v5e:2x2
jax: 0.10.0
libtpu: 0.0.40
codegen_flags: <defaults>
</compile_context>

<pallas_src>
import functools
import math

import numpy as np
import jax
import jax.numpy as jnp
from jax import lax
from jax.experimental import pallas as pl
from jax.experimental.pallas import tpu as pltpu


# --------------------------------------------------------------------------
# Planning helpers (run in the Python wrapper, not in the kernel).
# --------------------------------------------------------------------------
def _band_plan(theta, B, H, W, tile_p, num_p):
    """Static source-row band height + per-(b, dst-tile) band indices.

    Returns (BAND, two_bands, bidx_a, bidx_b).  Falls back to a single
    full-height band (BAND = H) when theta is traced, no lane-aligned
    H-dividing band height covers every tile's source rows, or banding would
    not actually reduce work.
    """
    full = (H, False,
            np.zeros((B * num_p,), np.int32), np.zeros((B * num_p,), np.int32))
    # band*W must be a multiple of 128 so the flattened-HW block stays
    # lane-aligned; band must divide H so no partial (garbage-padded) blocks.
    row_align = 128 // math.gcd(W, 128)
    d_cands = [d for d in range(row_align, H, row_align) if H % d == 0]
    if not d_cands:
        return full
    try:
        t = np.asarray(jax.device_get(theta), dtype=np.float64).reshape(B, 6)
    except Exception:            # theta is a tracer (wrapper called under jit)
        return full
    if not np.all(np.isfinite(t)):
        return full

    t10, t11, t12 = t[:, 3], t[:, 4], t[:, 5]
    lo = np.zeros((B, num_p), np.int64)
    hi = np.zeros((B, num_p), np.int64)
    for p in range(num_p):
        r0 = (p * tile_p) // W
        r1 = ((p + 1) * tile_p - 1) // W
        yb0 = 2.0 * r0 / (H - 1) - 1.0
        yb1 = 2.0 * r1 / (H - 1) - 1.0
        # xb conservatively spans the full [-1, 1] width of the image.
        gy_lo = t12 - np.abs(t10) + np.minimum(t11 * yb0, t11 * yb1)
        gy_hi = t12 + np.abs(t10) + np.maximum(t11 * yb0, t11 * yb1)
        iy_lo = (gy_lo + 1.0) * 0.5 * (H - 1)
        iy_hi = (gy_hi + 1.0) * 0.5 * (H - 1)
        # +-1 row of slack absorbs f32-vs-f64 rounding near integer boundaries.
        lo[:, p] = np.clip(np.floor(iy_lo) - 1, 0, H - 1).astype(np.int64)
        hi[:, p] = np.clip(np.floor(iy_hi) + 2, 0, H - 1).astype(np.int64)
    hi = np.maximum(hi, lo)
    span = int((hi - lo + 1).max())

    band = None
    for d in d_cands:
        # Two adjacent bands of height d cover any row range of span <= d,
        # wherever it falls relative to the fixed band grid.
        if d >= span and 2 * d < H:
            band = d
            break
    if band is None:
        return full
    n_bands = H // band
    bidx_a = (lo // band).astype(np.int32).reshape(-1)          # b*num_p + p
    bidx_b = np.minimum(bidx_a + 1, n_bands - 1).astype(np.int32)
    return band, True, bidx_a, bidx_b


def _plan(theta, B, C, H, W):
    """Choose (TILE_P, num_p, BAND, two_bands, bidx_a, bidx_b, vmem_limit)."""
    HW = H * W
    try:
        vmem_phys = int(pltpu.get_tpu_info().vmem_capacity_bytes)
    except Exception:
        vmem_phys = 64 * 1024 * 1024          # conservative (v7x per-core VMEM)
    vmem_limit = max(32 << 20, int(0.75 * vmem_phys))   # ~48 MiB v7x, ~96 MiB v5e/v6e
    budget = vmem_limit - (2 << 20)

    # dst-tile candidates: whole image first (fewest pipeline steps for small
    # problems), then lane-dense tiles; multiples of 256 preferred (v6e/v7x MXU).
    cands = [HW]
    for tp in (512, 256, 128):
        if HW % tp == 0 and HW // tp >= 2:
            cands.append(tp)

    def estimate(tp, K, nblk):
        return 4 * (2 * nblk * C * K       # x band blocks, double-buffered
                    + 4 * tp               # base coords block, double-buffered
                    + 2 * C * tp           # output block, double-buffered
                    + 6 * nblk * K * tp)   # (K_eff, TILE_P) S-build temporaries

    chosen = None
    for tp in cands:
        num_p = HW // tp
        band, two, ba, bb = _band_plan(theta, B, H, W, tp, num_p)
        if estimate(tp, band * W, 2 if two else 1) <= budget:
            chosen = (tp, num_p, band, two, ba, bb)
            break
    if chosen is None:
        # TODO(synk): for images where even the smallest tile/band does not fit
        # VMEM, split the contraction (K) axis across an extra grid dimension
        # with a VMEM accumulator, and/or set pipeline_mode=pl.Buffered(1) on
        # the x band BlockSpecs to drop their double buffer.
        tp = cands[-1]
        num_p = HW // tp
        band, two, ba, bb = _band_plan(theta, B, H, W, tp, num_p)
        chosen = (tp, num_p, band, two, ba, bb)
    tp, num_p, band, two, ba, bb = chosen
    return tp, num_p, band, two, ba, bb, vmem_limit


# --------------------------------------------------------------------------
# Pallas kernel: bilinear grid_sample for one (batch, dst-tile) grid step.
# --------------------------------------------------------------------------
def _affine_sample_kernel(theta_ref, ba_ref, bb_ref, base_ref, *data_refs,
                          H, W, TILE_P, BAND, NUM_P, TWO_BANDS):
    # theta_ref : SMEM (B*6,) f32  -- [t00 t01 t02 t10 t11 t12] per batch
    # ba_ref    : SMEM (B*num_p,) i32 -- band-A index per (b, dst-tile)
    # bb_ref    : SMEM (B*num_p,) i32 -- band-B index (used by the index_map)
    # base_ref  : VMEM (2, TILE_P) f32 -- row 0: xb, row 1: yb (align_corners)
    # x band(s) : VMEM (1, C, BAND*W)
    # o_ref     : VMEM (1, C, TILE_P)
    if TWO_BANDS:
        xa_ref, xb_ref, o_ref = data_refs
    else:
        xa_ref, o_ref = data_refs
        xb_ref = None
    del bb_ref  # only consumed by the band-B index_map

    b = pl.program_id(0)
    p = pl.program_id(1)
    t00 = theta_ref[b * 6 + 0]
    t01 = theta_ref[b * 6 + 1]
    t02 = theta_ref[b * 6 + 2]
    t10 = theta_ref[b * 6 + 3]
    t11 = theta_ref[b * 6 + 4]
    t12 = theta_ref[b * 6 + 5]

    base = base_ref[...]                       # (2, TILE_P)
    nx = base[0:1, :]                          # normalized dst x
    ny = base[1:2, :]                          # normalized dst y

    # affine_grid (align_corners=True), then grid_sample pixel coords.
    gx = t00 * nx + t01 * ny + t02
    gy = t10 * nx + t11 * ny + t12
    ix = (gx + 1.0) * (0.5 * (W - 1))
    iy = (gy + 1.0) * (0.5 * (H - 1))
    # Clamp before the int cast so degenerate thetas cannot overflow int32;
    # any clamped pixel has all four corners out of bounds (zero weight).
    ix = jnp.clip(ix, -2.0, float(W + 1))
    iy = jnp.clip(iy, -2.0, float(H + 1))

    ix0f = jnp.floor(ix)
    iy0f = jnp.floor(iy)
    fx = ix - ix0f
    fy = iy - iy0f
    ix0 = ix0f.astype(jnp.int32)
    iy0 = iy0f.astype(jnp.int32)
    ix1 = ix0 + 1
    iy1 = iy0 + 1

    # Per-corner bilinear weights; zeros padding == zero weight out of bounds.
    def corner_weight(iyc, ixc, w):
        valid = (ixc >= 0) & (ixc < W) & (iyc >= 0) & (iyc < H)
        return jnp.where(valid, w, 0.0)        # (1, TILE_P) f32

    w00 = corner_weight(iy0, ix0, (1.0 - fy) * (1.0 - fx))
    w01 = corner_weight(iy0, ix1, (1.0 - fy) * fx)
    w10 = corner_weight(iy1, ix0, fy * (1.0 - fx))
    w11 = corner_weight(iy1, ix1, fy * fx)

    K = BAND * W
    K_eff = 2 * K if TWO_BANDS else K
    row_start = ba_ref[b * NUM_P + p] * K      # flat src offset of band A

    # One-hot of the (iy0, ix0) corner, relative to band A.  The mod keeps the
    # rolled masks aligned even when that corner is out of bounds / out of the
    # band (its weight is already zero, so the wrapped row contributes 0).
    idx00 = jnp.mod(iy0 * W + ix0 - row_start, K_eff)           # (1, TILE_P)
    q = lax.broadcasted_iota(jnp.int32, (K_eff, TILE_P), 0)     # src flat index
    eq = q == idx00                                             # one compare, reused

    # Fold the bilinear weights into the compare (no bool->f32 cast, no full
    # (K_eff, TILE_P) multiplies); the other 3 corners are sublane rolls (XLU).
    S = jnp.where(eq, w00, 0.0)
    S = S + pltpu.roll(jnp.where(eq, w01, 0.0), shift=1, axis=0)
    S = S + pltpu.roll(jnp.where(eq, w10, 0.0), shift=W, axis=0)
    S = S + pltpu.roll(jnp.where(eq, w11, 0.0), shift=W + 1, axis=0)

    # Kept in f32: bf16 weights would blow the 1e-3 rtol/atol budget, and with
    # tiny C the MXU is never the binding unit anyway.
    xa = xa_ref[0].astype(jnp.float32)                           # (C, K)
    if TWO_BANDS:
        out = jnp.dot(xa, S[:K, :], preferred_element_type=jnp.float32)
        out = out + jnp.dot(xb_ref[0].astype(jnp.float32), S[K:, :],
                            preferred_element_type=jnp.float32)
    else:
        out = jnp.dot(xa, S, preferred_element_type=jnp.float32)
    o_ref[0] = out.astype(o_ref.dtype)


def affine_warp_pallas(x, theta):
    """x: (B, C, H, W) f32, theta: (B, 6) f32 -> (B, C, H, W)."""
    B, C, H, W = x.shape
    if H < 2 or W < 2:
        raise ValueError("align_corners=True normalization requires H >= 2 and W >= 2")
    HW = H * W

    TILE_P, num_p, BAND, two_bands, bidx_a, bidx_b, vmem_limit = _plan(
        theta, B, C, H, W)
    K = BAND * W

    x_flat = x.reshape(B, C, HW)
    theta_flat = theta.reshape(B * 6).astype(jnp.float32)
    ba = jnp.asarray(bidx_a, dtype=jnp.int32)
    bb = jnp.asarray(bidx_b, dtype=jnp.int32)

    # Hoisted base normalized coords (dst flat index p = h*W + w).
    xb = jnp.tile(2.0 * jnp.arange(W, dtype=jnp.float32) / (W - 1) - 1.0, H)
    yb = jnp.repeat(2.0 * jnp.arange(H, dtype=jnp.float32) / (H - 1) - 1.0, W)
    base = jnp.stack([xb, yb], axis=0)                           # (2, HW)

    kernel = functools.partial(
        _affine_sample_kernel, H=H, W=W, TILE_P=TILE_P, BAND=BAND,
        NUM_P=num_p, TWO_BANDS=two_bands)

    # TODO(synk): if VMEM is tight on v7x, add pipeline_mode=pl.Buffered(1) to
    # the x band BlockSpecs (their block index only changes with b / the band).
    x_specs = [pl.BlockSpec((1, C, K),
                            lambda b, p, th, ba, bb: (b, 0, ba[b * num_p + p]))]
    operands = [theta_flat, ba, bb, base, x_flat]
    if two_bands:
        x_specs.append(pl.BlockSpec((1, C, K),
                                    lambda b, p, th, ba, bb: (b, 0, bb[b * num_p + p])))
        operands.append(x_flat)

    grid_spec = pltpu.PrefetchScalarGridSpec(
        num_scalar_prefetch=3,
        grid=(B, num_p),
        in_specs=[pl.BlockSpec((2, TILE_P), lambda b, p, th, ba, bb: (0, p))]
                 + x_specs,
        out_specs=pl.BlockSpec((1, C, TILE_P), lambda b, p, th, ba, bb: (b, 0, p)),
    )

    out = pl.pallas_call(
        kernel,
        out_shape=jax.ShapeDtypeStruct((B, C, HW), x.dtype),
        grid_spec=grid_spec,
        compiler_params=pltpu.CompilerParams(
            # Shard the *batch* axis across v7x cores (one image/band stream
            # per core); the dst-tile axis just iterates.
            dimension_semantics=("parallel", "arbitrary"),
            vmem_limit_bytes=vmem_limit,
        ),
    )(*operands)
    return out.reshape(B, C, H, W)


# --------------------------------------------------------------------------
# Plain-JAX glue: build the (B, 2, 3) affine matrices exactly like the module.
# --------------------------------------------------------------------------
def build_theta(batch, H, W, angle=None, translation=None, scale_factor=None,
                shear=None, center=None):
    angle = angle if angle is not None else jnp.zeros((batch,))
    translation = translation if translation is not None else jnp.zeros((batch, 2))
    scale_factor = scale_factor if scale_factor is not None else jnp.ones((batch, 2))
    shear = shear if shear is not None else jnp.zeros((batch, 2))
    center = center if center is not None else jnp.tile(
        jnp.array([W / 2.0, H / 2.0]), (batch, 1))

    a = angle * jnp.pi / 180.0
    cos_a, sin_a = jnp.cos(a), jnp.sin(a)
    rot = jnp.stack([cos_a, -sin_a, sin_a, cos_a], axis=-1).reshape(batch, 2, 2)
    scale_m = jax.vmap(jnp.diag)(scale_factor)
    ones = jnp.ones_like(shear[:, 0])
    shear_m = jnp.stack([ones, shear[:, 0], shear[:, 1], ones],
                        axis=-1).reshape(batch, 2, 2)
    transform = rot @ scale_m @ shear_m

    eye3 = jnp.tile(jnp.eye(3, dtype=jnp.float32), (batch, 1, 1))
    center_m = eye3.at[:, 0, 2].set(center[:, 0]).at[:, 1, 2].set(center[:, 1])
    trans_m = eye3.at[:, 0, 2].set(translation[:, 0]).at[:, 1, 2].set(translation[:, 1])
    full = eye3.at[:, :2, :2].set(transform)
    full = trans_m @ center_m @ full @ jnp.linalg.inv(center_m)
    return full[:, :2, :].reshape(batch, 6).astype(jnp.float32)


# --------------------------------------------------------------------------
# Pure-JAX reference (same math, gather-based) used only for validation.
# --------------------------------------------------------------------------
def affine_warp_ref(x, theta):
    B, C, H, W = x.shape
    t = theta.reshape(B, 2, 3)
    xb = (2.0 * jnp.arange(W, dtype=jnp.float32) / (W - 1) - 1.0)[None, None, :]
    yb = (2.0 * jnp.arange(H, dtype=jnp.float32) / (H - 1) - 1.0)[None, :, None]
    gx = t[:, 0, 0, None, None] * xb + t[:, 0, 1, None, None] * yb + t[:, 0, 2, None, None]
    gy = t[:, 1, 0, None, None] * xb + t[:, 1, 1, None, None] * yb + t[:, 1, 2, None, None]
    ix = (gx + 1.0) * 0.5 * (W - 1)
    iy = (gy + 1.0) * 0.5 * (H - 1)
    ix0f, iy0f = jnp.floor(ix), jnp.floor(iy)
    fx, fy = ix - ix0f, iy - iy0f
    ix0, iy0 = ix0f.astype(jnp.int32), iy0f.astype(jnp.int32)

    def sample_one(img, iyc, ixc, valid):
        v = img[:, jnp.clip(iyc, 0, H - 1), jnp.clip(ixc, 0, W - 1)]  # (C,H,W)
        return jnp.where(valid[None], v, 0.0)

    def corner(iyc, ixc, wgt):
        valid = (ixc >= 0) & (ixc < W) & (iyc >= 0) & (iyc < H)
        v = jax.vmap(sample_one)(x, iyc, ixc, valid)                  # (B,C,H,W)
        return v * wgt[:, None]

    return (corner(iy0, ix0, (1 - fy) * (1 - fx))
            + corner(iy0, ix0 + 1, (1 - fy) * fx)
            + corner(iy0 + 1, ix0, fy * (1 - fx))
            + corner(iy0 + 1, ix0 + 1, fy * fx))


if __name__ == "__main__":
    key = jax.random.PRNGKey(0)
    k1, k2 = jax.random.split(key)

    # --- Test 1: module-sized problem (B=2, C=4, 16x16); rotation/translation
    #     push many corners onto the border and fully outside the image, so
    #     the zeros-padding / roll-wrap invariant is exercised.  Single dst
    #     tile, full source band.
    B, C, H, W = 2, 4, 16, 16
    x = jax.random.normal(k1, (B, C, H, W), dtype=jnp.float32)
    angle = jnp.array([5.0, -10.0], dtype=jnp.float32)
    translation = jnp.array([[0.1, -0.2], [0.05, 0.3]], dtype=jnp.float32)
    scale_factor = jnp.array([[1.1, 0.9], [0.8, 1.2]], dtype=jnp.float32)
    shear = jnp.array([[0.1, -0.05], [0.0, 0.2]], dtype=jnp.float32)
    theta = build_theta(B, H, W, angle, translation, scale_factor, shear)

    out = jax.block_until_ready(affine_warp_pallas(x, theta))
    ref = jax.block_until_ready(affine_warp_ref(x, theta))
    np.testing.assert_allclose(np.asarray(out), np.asarray(ref),
                               rtol=1e-3, atol=1e-3)

    # --- Test 2: larger image with a near-identity warp so the band-limited
    #     two-band contraction path (varying + clamped band indices, multiple
    #     dst tiles per batch element) is exercised end-to-end.
    B2, C2, H2, W2 = 2, 3, 64, 64
    x2 = jax.random.normal(k2, (B2, C2, H2, W2), dtype=jnp.float32)
    angle2 = jnp.array([0.0, -2.0], dtype=jnp.float32)
    translation2 = jnp.array([[0.02, -0.03], [0.01, 0.04]], dtype=jnp.float32)
    scale2 = jnp.array([[1.0, 1.0], [0.98, 1.0]], dtype=jnp.float32)
    shear2 = jnp.array([[0.0, 0.0], [0.0, -0.01]], dtype=jnp.float32)
    theta2 = build_theta(B2, H2, W2, angle2, translation2, scale2, shear2)

    out2 = jax.block_until_ready(affine_warp_pallas(x2, theta2))
    ref2 = jax.block_until_ready(affine_warp_ref(x2, theta2))
    np.testing.assert_allclose(np.asarray(out2), np.asarray(ref2),
                               rtol=1e-3, atol=1e-3)

    print("KERNEL_OK")
</pallas_src>

<mosaic_0001>
module attributes {stable_mosaic.version = 11 : i64} {
  func.func @_affine_sample_kernel(%arg0: i32, %arg1: i32, %arg2: memref<12xf32, #tpu.memory_space<smem>>, %arg3: memref<2xi32, #tpu.memory_space<smem>>, %arg4: memref<2xi32, #tpu.memory_space<smem>>, %arg5: memref<2x256xf32, #tpu.memory_space<vmem>>, %arg6: memref<1x4x256xf32, #tpu.memory_space<vmem>>, %arg7: memref<1x4x256xf32, #tpu.memory_space<vmem>>) attributes {dimension_semantics = [#tpu.dimension_semantics<parallel>, #tpu.dimension_semantics<arbitrary>], iteration_bounds = array<i64: 2, 1>, scalar_prefetch = 3 : i64, scratch_operands = 0 : i64, tpu.core_type = #tpu.core_type<tc>, window_params = [{transform_indices = @transform_0, window_bounds = array<i64: 2, 256>}, {transform_indices = @transform_1, window_bounds = array<i64: 1, 4, 256>}, {transform_indices = @transform_2, window_bounds = array<i64: 1, 4, 256>}]} {
    %c6_i32 = arith.constant 6 : i32
    %0 = arith.muli %arg0, %c6_i32 : i32
    %c0_i32 = arith.constant 0 : i32
    %1 = arith.addi %0, %c0_i32 : i32
    %2 = arith.index_cast %1 : i32 to index
    %3 = memref.load %arg2[%2] : memref<12xf32, #tpu.memory_space<smem>>
    %c6_i32_0 = arith.constant 6 : i32
    %4 = arith.muli %arg0, %c6_i32_0 : i32
    %c1_i32 = arith.constant 1 : i32
    %5 = arith.addi %4, %c1_i32 : i32
    %6 = arith.index_cast %5 : i32 to index
    %7 = memref.load %arg2[%6] : memref<12xf32, #tpu.memory_space<smem>>
    %c6_i32_1 = arith.constant 6 : i32
    %8 = arith.muli %arg0, %c6_i32_1 : i32
    %c2_i32 = arith.constant 2 : i32
    %9 = arith.addi %8, %c2_i32 : i32
    %10 = arith.index_cast %9 : i32 to index
    %11 = memref.load %arg2[%10] : memref<12xf32, #tpu.memory_space<smem>>
    %c6_i32_2 = arith.constant 6 : i32
    %12 = arith.muli %arg0, %c6_i32_2 : i32
    %c3_i32 = arith.constant 3 : i32
    %13 = arith.addi %12, %c3_i32 : i32
    %14 = arith.index_cast %13 : i32 to index
    %15 = memref.load %arg2[%14] : memref<12xf32, #tpu.memory_space<smem>>
    %c6_i32_3 = arith.constant 6 : i32
    %16 = arith.muli %arg0, %c6_i32_3 : i32
    %c4_i32 = arith.constant 4 : i32
    %17 = arith.addi %16, %c4_i32 : i32
    %18 = arith.index_cast %17 : i32 to index
    %19 = memref.load %arg2[%18] : memref<12xf32, #tpu.memory_space<smem>>
    %c6_i32_4 = arith.constant 6 : i32
    %20 = arith.muli %arg0, %c6_i32_4 : i32
    %c5_i32 = arith.constant 5 : i32
    %21 = arith.addi %20, %c5_i32 : i32
    %22 = arith.index_cast %21 : i32 to index
    %23 = memref.load %arg2[%22] : memref<12xf32, #tpu.memory_space<smem>>
    %c0 = arith.constant 0 : index
    %c0_5 = arith.constant 0 : index
    %24 = vector.load %arg5[%c0, %c0_5] : memref<2x256xf32, #tpu.memory_space<vmem>>, vector<2x256xf32>
    %25 = vector.extract_strided_slice %24 {offsets = [0, 0], sizes = [1, 256], strides = [1, 1]} : vector<2x256xf32> to vector<1x256xf32>
    %26 = vector.extract_strided_slice %24 {offsets = [1, 0], sizes = [1, 256], strides = [1, 1]} : vector<2x256xf32> to vector<1x256xf32>
    %27 = vector.broadcast %3 : f32 to vector<1x256xf32>
    %28 = arith.mulf %27, %25 : vector<1x256xf32>
    %29 = vector.broadcast %7 : f32 to vector<1x256xf32>
    %30 = arith.mulf %29, %26 : vector<1x256xf32>
    %31 = arith.addf %28, %30 : vector<1x256xf32>
    %32 = vector.broadcast %11 : f32 to vector<1x256xf32>
    %33 = arith.addf %31, %32 : vector<1x256xf32>
    %34 = vector.broadcast %15 : f32 to vector<1x256xf32>
    %35 = arith.mulf %34, %25 : vector<1x256xf32>
    %36 = vector.broadcast %19 : f32 to vector<1x256xf32>
    %37 = arith.mulf %36, %26 : vector<1x256xf32>
    %38 = arith.addf %35, %37 : vector<1x256xf32>
    %39 = vector.broadcast %23 : f32 to vector<1x256xf32>
    %40 = arith.addf %38, %39 : vector<1x256xf32>
    %cst = arith.constant 1.000000e+00 : f32
    %41 = vector.broadcast %cst : f32 to vector<1x256xf32>
    %42 = arith.addf %33, %41 : vector<1x256xf32>
    %cst_6 = arith.constant 7.500000e+00 : f32
    %43 = vector.broadcast %cst_6 : f32 to vector<1x256xf32>
    %44 = arith.mulf %42, %43 : vector<1x256xf32>
    %cst_7 = arith.constant 1.000000e+00 : f32
    %45 = vector.broadcast %cst_7 : f32 to vector<1x256xf32>
    %46 = arith.addf %40, %45 : vector<1x256xf32>
    %cst_8 = arith.constant 7.500000e+00 : f32
    %47 = vector.broadcast %cst_8 : f32 to vector<1x256xf32>
    %48 = arith.mulf %46, %47 : vector<1x256xf32>
    %cst_9 = arith.constant -2.000000e+00 : f32
    %cst_10 = arith.constant 1.700000e+01 : f32
    %49 = vector.broadcast %cst_9 : f32 to vector<1x256xf32>
    %50 = arith.maximumf %49, %44 : vector<1x256xf32>
    %51 = vector.broadcast %cst_10 : f32 to vector<1x256xf32>
    %52 = arith.minimumf %51, %50 : vector<1x256xf32>
    %cst_11 = arith.constant -2.000000e+00 : f32
    %cst_12 = arith.constant 1.700000e+01 : f32
    %53 = vector.broadcast %cst_11 : f32 to vector<1x256xf32>
    %54 = arith.maximumf %53, %48 : vector<1x256xf32>
    %55 = vector.broadcast %cst_12 : f32 to vector<1x256xf32>
    %56 = arith.minimumf %55, %54 : vector<1x256xf32>
    %57 = math.floor %52 : vector<1x256xf32>
    %58 = math.floor %56 : vector<1x256xf32>
    %59 = arith.subf %52, %57 : vector<1x256xf32>
    %60 = arith.subf %56, %58 : vector<1x256xf32>
    %61 = arith.fptosi %57 : vector<1x256xf32> to vector<1x256xi32>
    %62 = arith.fptosi %58 : vector<1x256xf32> to vector<1x256xi32>
    %c1_i32_13 = arith.constant 1 : i32
    %63 = vector.broadcast %c1_i32_13 : i32 to vector<1x256xi32>
    %64 = arith.addi %61, %63 : vector<1x256xi32>
    %c1_i32_14 = arith.constant 1 : i32
    %65 = vector.broadcast %c1_i32_14 : i32 to vector<1x256xi32>
    %66 = arith.addi %62, %65 : vector<1x256xi32>
    %cst_15 = arith.constant 1.000000e+00 : f32
    %67 = vector.broadcast %cst_15 : f32 to vector<1x256xf32>
    %68 = arith.subf %67, %60 : vector<1x256xf32>
    %cst_16 = arith.constant 1.000000e+00 : f32
    %69 = vector.broadcast %cst_16 : f32 to vector<1x256xf32>
    %70 = arith.subf %69, %59 : vector<1x256xf32>
    %71 = arith.mulf %68, %70 : vector<1x256xf32>
    %c0_i32_17 = arith.constant 0 : i32
    %72 = vector.broadcast %c0_i32_17 : i32 to vector<1x256xi32>
    %73 = arith.cmpi sge, %61, %72 : vector<1x256xi32>
    %c16_i32 = arith.constant 16 : i32
    %74 = vector.broadcast %c16_i32 : i32 to vector<1x256xi32>
    %75 = arith.cmpi slt, %61, %74 : vector<1x256xi32>
    %76 = arith.andi %73, %75 : vector<1x256xi1>
    %c0_i32_18 = arith.constant 0 : i32
    %77 = vector.broadcast %c0_i32_18 : i32 to vector<1x256xi32>
    %78 = arith.cmpi sge, %62, %77 : vector<1x256xi32>
    %79 = arith.andi %76, %78 : vector<1x256xi1>
    %c16_i32_19 = arith.constant 16 : i32
    %80 = vector.broadcast %c16_i32_19 : i32 to vector<1x256xi32>
    %81 = arith.cmpi slt, %62, %80 : vector<1x256xi32>
    %82 = arith.andi %79, %81 : vector<1x256xi1>
    %cst_20 = arith.constant 0.000000e+00 : f32
    %83 = vector.broadcast %cst_20 : f32 to vector<1x256xf32>
    %84 = arith.select %82, %71, %83 : vector<1x256xi1>, vector<1x256xf32>
    %cst_21 = arith.constant 1.000000e+00 : f32
    %85 = vector.broadcast %cst_21 : f32 to vector<1x256xf32>
    %86 = arith.subf %85, %60 : vector<1x256xf32>
    %87 = arith.mulf %86, %59 : vector<1x256xf32>
    %c0_i32_22 = arith.constant 0 : i32
    %88 = vector.broadcast %c0_i32_22 : i32 to vector<1x256xi32>
    %89 = arith.cmpi sge, %64, %88 : vector<1x256xi32>
    %c16_i32_23 = arith.constant 16 : i32
    %90 = vector.broadcast %c16_i32_23 : i32 to vector<1x256xi32>
    %91 = arith.cmpi slt, %64, %90 : vector<1x256xi32>
    %92 = arith.andi %89, %91 : vector<1x256xi1>
    %c0_i32_24 = arith.constant 0 : i32
    %93 = vector.broadcast %c0_i32_24 : i32 to vector<1x256xi32>
    %94 = arith.cmpi sge, %62, %93 : vector<1x256xi32>
    %95 = arith.andi %92, %94 : vector<1x256xi1>
    %c16_i32_25 = arith.constant 16 : i32
    %96 = vector.broadcast %c16_i32_25 : i32 to vector<1x256xi32>
    %97 = arith.cmpi slt, %62, %96 : vector<1x256xi32>
    %98 = arith.andi %95, %97 : vector<1x256xi1>
    %cst_26 = arith.constant 0.000000e+00 : f32
    %99 = vector.broadcast %cst_26 : f32 to vector<1x256xf32>
    %100 = arith.select %98, %87, %99 : vector<1x256xi1>, vector<1x256xf32>
    %cst_27 = arith.constant 1.000000e+00 : f32
    %101 = vector.broadcast %cst_27 : f32 to vector<1x256xf32>
    %102 = arith.subf %101, %59 : vector<1x256xf32>
    %103 = arith.mulf %60, %102 : vector<1x256xf32>
    %c0_i32_28 = arith.constant 0 : i32
    %104 = vector.broadcast %c0_i32_28 : i32 to vector<1x256xi32>
    %105 = arith.cmpi sge, %61, %104 : vector<1x256xi32>
    %c16_i32_29 = arith.constant 16 : i32
    %106 = vector.broadcast %c16_i32_29 : i32 to vector<1x256xi32>
    %107 = arith.cmpi slt, %61, %106 : vector<1x256xi32>
    %108 = arith.andi %105, %107 : vector<1x256xi1>
    %c0_i32_30 = arith.constant 0 : i32
    %109 = vector.broadcast %c0_i32_30 : i32 to vector<1x256xi32>
    %110 = arith.cmpi sge, %66, %109 : vector<1x256xi32>
    %111 = arith.andi %108, %110 : vector<1x256xi1>
    %c16_i32_31 = arith.constant 16 : i32
    %112 = vector.broadcast %c16_i32_31 : i32 to vector<1x256xi32>
    %113 = arith.cmpi slt, %66, %112 : vector<1x256xi32>
    %114 = arith.andi %111, %113 : vector<1x256xi1>
    %cst_32 = arith.constant 0.000000e+00 : f32
    %115 = vector.broadcast %cst_32 : f32 to vector<1x256xf32>
    %116 = arith.select %114, %103, %115 : vector<1x256xi1>, vector<1x256xf32>
    %117 = arith.mulf %60, %59 : vector<1x256xf32>
    %c0_i32_33 = arith.constant 0 : i32
    %118 = vector.broadcast %c0_i32_33 : i32 to vector<1x256xi32>
    %119 = arith.cmpi sge, %64, %118 : vector<1x256xi32>
    %c16_i32_34 = arith.constant 16 : i32
    %120 = vector.broadcast %c16_i32_34 : i32 to vector<1x256xi32>
    %121 = arith.cmpi slt, %64, %120 : vector<1x256xi32>
    %122 = arith.andi %119, %121 : vector<1x256xi1>
    %c0_i32_35 = arith.constant 0 : i32
    %123 = vector.broadcast %c0_i32_35 : i32 to vector<1x256xi32>
    %124 = arith.cmpi sge, %66, %123 : vector<1x256xi32>
    %125 = arith.andi %122, %124 : vector<1x256xi1>
    %c16_i32_36 = arith.constant 16 : i32
    %126 = vector.broadcast %c16_i32_36 : i32 to vector<1x256xi32>
    %127 = arith.cmpi slt, %66, %126 : vector<1x256xi32>
    %128 = arith.andi %125, %127 : vector<1x256xi1>
    %cst_37 = arith.constant 0.000000e+00 : f32
    %129 = vector.broadcast %cst_37 : f32 to vector<1x256xf32>
    %130 = arith.select %128, %117, %129 : vector<1x256xi1>, vector<1x256xf32>
    %c1_i32_38 = arith.constant 1 : i32
    %131 = arith.muli %arg0, %c1_i32_38 : i32
    %132 = arith.addi %131, %arg1 : i32
    %133 = arith.index_cast %132 : i32 to index
    %134 = memref.load %arg3[%133] : memref<2xi32, #tpu.memory_space<smem>>
    %c256_i32 = arith.constant 256 : i32
    %135 = arith.muli %134, %c256_i32 : i32
    %c16_i32_39 = arith.constant 16 : i32
    %136 = vector.broadcast %c16_i32_39 : i32 to vector<1x256xi32>
    %137 = arith.muli %62, %136 : vector<1x256xi32>
    %138 = arith.addi %137, %61 : vector<1x256xi32>
    %139 = vector.broadcast %135 : i32 to vector<1x256xi32>
    %140 = arith.subi %138, %139 : vector<1x256xi32>
    %c256_i32_40 = arith.constant 256 : i32
    %c0_i32_41 = arith.constant 0 : i32
    %141 = arith.cmpi eq, %c256_i32_40, %c0_i32_41 : i32
    %c1_i32_42 = arith.constant 1 : i32
    %142 = arith.select %141, %c1_i32_42, %c256_i32_40 : i32
    %143 = vector.broadcast %142 : i32 to vector<1x256xi32>
    %144 = arith.remsi %140, %143 : vector<1x256xi32>
    %c0_i32_43 = arith.constant 0 : i32
    %145 = vector.broadcast %c0_i32_43 : i32 to vector<1x256xi32>
    %146 = arith.cmpi ne, %144, %145 : vector<1x256xi32>
    %c0_i32_44 = arith.constant 0 : i32
    %147 = vector.broadcast %c0_i32_44 : i32 to vector<1x256xi32>
    %148 = arith.cmpi slt, %144, %147 : vector<1x256xi32>
    %c0_i32_45 = arith.constant 0 : i32
    %149 = arith.cmpi slt, %142, %c0_i32_45 : i32
    %150 = vector.broadcast %149 : i1 to vector<1x256xi1>
    %151 = vector.broadcast %150 : vector<1x256xi1> to vector<1x256xi1>
    %152 = arith.xori %148, %151 : vector<1x256xi1>
    %153 = arith.andi %152, %146 : vector<1x256xi1>
    %154 = vector.broadcast %142 : i32 to vector<1x256xi32>
    %155 = arith.addi %144, %154 : vector<1x256xi32>
    %156 = arith.select %153, %155, %144 : vector<1x256xi1>, vector<1x256xi32>
    %157 = tpu.iota {dimensions = array<i32: 0>} : vector<256x256xi32>
    %158 = vector.broadcast %156 : vector<1x256xi32> to vector<256x256xi32>
    %159 = arith.cmpi eq, %157, %158 : vector<256x256xi32>
    %cst_46 = arith.constant 0.000000e+00 : f32
    %160 = vector.shape_cast %84 : vector<1x256xf32> to vector<1x256xf32>
    %161 = vector.broadcast %160 : vector<1x256xf32> to vector<256x256xf32>
    %162 = vector.broadcast %cst_46 : f32 to vector<256x256xf32>
    %163 = arith.select %159, %161, %162 : vector<256x256xi1>, vector<256x256xf32>
    %cst_47 = arith.constant 0.000000e+00 : f32
    %164 = vector.shape_cast %100 : vector<1x256xf32> to vector<1x256xf32>
    %165 = vector.broadcast %164 : vector<1x256xf32> to vector<256x256xf32>
    %166 = vector.broadcast %cst_47 : f32 to vector<256x256xf32>
    %167 = arith.select %159, %165, %166 : vector<256x256xi1>, vector<256x256xf32>
    %c1_i32_48 = arith.constant 1 : i32
    %168 = tpu.dynamic_rotate %167 by %c1_i32_48 dim 0 : vector<256x256xf32>, i32 -> vector<256x256xf32>
    %169 = arith.addf %163, %168 : vector<256x256xf32>
    %cst_49 = arith.constant 0.000000e+00 : f32
    %170 = vector.shape_cast %116 : vector<1x256xf32> to vector<1x256xf32>
    %171 = vector.broadcast %170 : vector<1x256xf32> to vector<256x256xf32>
    %172 = vector.broadcast %cst_49 : f32 to vector<256x256xf32>
    %173 = arith.select %159, %171, %172 : vector<256x256xi1>, vector<256x256xf32>
    %c16_i32_50 = arith.constant 16 : i32
    %174 = tpu.dynamic_rotate %173 by %c16_i32_50 dim 0 : vector<256x256xf32>, i32 -> vector<256x256xf32>
    %175 = arith.addf %169, %174 : vector<256x256xf32>
    %cst_51 = arith.constant 0.000000e+00 : f32
    %176 = vector.shape_cast %130 : vector<1x256xf32> to vector<1x256xf32>
    %177 = vector.broadcast %176 : vector<1x256xf32> to vector<256x256xf32>
    %178 = vector.broadcast %cst_51 : f32 to vector<256x256xf32>
    %179 = arith.select %159, %177, %178 : vector<256x256xi1>, vector<256x256xf32>
    %c17_i32 = arith.constant 17 : i32
    %180 = tpu.dynamic_rotate %179 by %c17_i32 dim 0 : vector<256x256xf32>, i32 -> vector<256x256xf32>
    %181 = arith.addf %175, %180 : vector<256x256xf32>
    %c0_52 = arith.constant 0 : index
    %c0_53 = arith.constant 0 : index
    %c0_54 = arith.constant 0 : index
    %182 = vector.load %arg6[%c0_52, %c0_53, %c0_54] : memref<1x4x256xf32, #tpu.memory_space<vmem>>, vector<1x4x256xf32>
    %183 = vector.shape_cast %182 : vector<1x4x256xf32> to vector<4x256xf32>
    %cst_55 = arith.constant dense<0.000000e+00> : vector<4x256xf32>
    %184 = tpu.matmul %183, %181, %cst_55 {dimension_numbers = #tpu.dot_dimension_numbers<[1], [0], [0], [1], [0, 0, 1, 1], [], []>} : vector<4x256xf32>, vector<256x256xf32>, vector<4x256xf32> -> vector<4x256xf32>
    %c0_56 = arith.constant 0 : index
    %c0_57 = arith.constant 0 : index
    %c0_58 = arith.constant 0 : index
    %185 = vector.load %arg7[%c0_56, %c0_57, %c0_58] : memref<1x4x256xf32, #tpu.memory_space<vmem>>, vector<1x4x256xf32>
    %186 = vector.shape_cast %185 : vector<1x4x256xf32> to vector<4x256xf32>
    %187 = vector.shape_cast %184 : vector<4x256xf32> to vector<1x4x256xf32>
    tpu.vector_store %arg7[%c0_56, %c0_57, %c0_58], %187 {strides = array<i32>} : memref<1x4x256xf32, #tpu.memory_space<vmem>>, vector<1x4x256xf32>,
    return
  }
  func.func @transform_0(%arg0: i32, %arg1: i32, %arg2: memref<12xf32, #tpu.memory_space<smem>>, %arg3: memref<2xi32, #tpu.memory_space<smem>>, %arg4: memref<2xi32, #tpu.memory_space<smem>>) -> (i32, i32) {
    %c0_i32 = arith.constant 0 : i32
    %c0_i32_0 = arith.constant 0 : i32
    return %c0_i32, %arg1 : i32, i32
  }
  func.func @transform_1(%arg0: i32, %arg1: i32, %arg2: memref<12xf32, #tpu.memory_space<smem>>, %arg3: memref<2xi32, #tpu.memory_space<smem>>, %arg4: memref<2xi32, #tpu.memory_space<smem>>) -> (i32, i32, i32) {
    %c1_i32 = arith.constant 1 : i32
    %0 = arith.muli %arg0, %c1_i32 : i32
    %1 = arith.addi %0, %arg1 : i32
    %2 = arith.index_cast %1 : i32 to index
    %3 = memref.load %arg3[%2] : memref<2xi32, #tpu.memory_space<smem>>
    %c0_i32 = arith.constant 0 : i32
    %c0_i32_0 = arith.constant 0 : i32
    return %arg0, %c0_i32, %3 : i32, i32, i32
  }
  func.func @transform_2(%arg0: i32, %arg1: i32, %arg2: memref<12xf32, #tpu.memory_space<smem>>, %arg3: memref<2xi32, #tpu.memory_space<smem>>, %arg4: memref<2xi32, #tpu.memory_space<smem>>) -> (i32, i32, i32) {
    %c0_i32 = arith.constant 0 : i32
    %c0_i32_0 = arith.constant 0 : i32
    return %arg0, %c0_i32, %arg1 : i32, i32, i32
  }
}

</mosaic_0001>

<bundles_post_ra>
// kernel: tpu_custom_call.1
= control target key start
LH: loop header
LB: loop body
LE: loop exit
PB: predicated region body
PF: predicated region fallthrough
CT: control target
= control target key end

     0   :  { %s1718_s24 = smov [#allocation3]   ;;  %s1719_s25 = smov [#allocation4]   ;;  %s3991_s0 = inlined_call_operand.hbm [shape: f32[12], index: 0, kind: input, shape index: {}]   ;;  %s3992_s3 = inlined_call_operand.hbm [shape: f32[2,256], index: 3, kind: input, shape index: {}]   ;;  %s3993_s4 = inlined_call_operand.hbm [shape: f32[2,4,256], index: 4, kind: input, shape index: {}]   ;;  %s3994_s5 = inlined_call_operand.hbm [shape: f32[2,4,256], index: 5, kind: output, shape index: {}]   ;;  %s3995_s1 = inlined_call_operand.hbm [shape: s32[2], index: 1, kind: input, shape index: {}]   ;;  %s3996_s2 = inlined_call_operand.vmem [shape: s32[2], index: 2, kind: input, shape index: {}]  }
   0x1   :  { %4033 = sst [smem:[#allocation24_spill]] %s3992_s3  ;;  %s11_s20 = sshll.u32 %s3991_s0, 4  ;;  %s12_s20 = int_to_ptr.hbm [resolvable:$true] %s11_s20 }
   0x2   :  { %s16_s23 = sshll.u32 %s3995_s1, 4  ;;  %s21_s28 = sshll.u32 %s3996_s2, 4  ;;  %s17_s23 = int_to_ptr.hbm [resolvable:$true] %s16_s23  ;;  %s22_s28 = int_to_ptr.vmem [resolvable:$true] %s21_s28 }
   0x3   :  { %14 = dma.hbm_to_smem %s12_s20, 16, %s1718_s24, [#allocation2] }
   0x4   :  { %19 = dma.hbm_to_smem %s17_s23, 16, %s1719_s25, [#allocation2] }
   0x5   :  { %s1720_s29 = smov [#allocation5]  }
   0x6   :  { %24 = dma.vmem_to_smem %s22_s28, 16, %s1720_s29, [#allocation2] }
   0x7   :  { %1668 = dma.done.wait [#allocation2], 48 }
   0x8   :  { %1669 = vsyncadd [#allocation2], 4294967248 }
   0x9   :  { %27 = sfence }
   0xa   :  { %28 = vsyncpa [#allocation7], 0 }
   0xb   :  { %29 = vsyncpa [#allocation10], 0 }
   0xc   :  { %31 = vsyncpa [#allocation10 + $0x1], 0 }
   0xd   :  { %32 = vsyncpa [#allocation8], 0 }
   0xe   :  { %34 = vsyncpa [#allocation8 + $0x1], 0  ;;  %s1761_s0 = smov 0   ;;  %s1763_s1 = smov 0  }
   0xf   :  { %s1765_s30 = smov 0   ;;  %s1767_s6 = smov 0  }
  0x10   :  { %s1769_s2 = smov 0   ;;  %s1771_s7 = smov 0  }
  0x11   :  { %s1773_s8 = smov 0   ;;  %s1775_s9 = smov 0  }
  0x12   :  { %s1777_s10 = smov 0  }
  0x13 LB: > { %4034 = sst [smem:[#allocation18_spill]] %s1692_s30  ;;  %s1378_s11 = sadd.s32 4294967295, %s1716_s10   ;;  %s1716_s10 = sphi %s1777_s10, %s40_s10   ;;  %s1712_s9 = sphi %s1775_s9, %s4101_s9   ;;  %s1708_s8 = sphi %s1773_s8, %s4100_s8   ;;  %s1704_s7 = sphi %s1771_s7, %s4094_s7   ;;  %s1700_s2 = sphi %s1769_s2, %s4099_s2   ;;  %s1696_s6 = sphi %s1767_s6, %s4098_s6   ;;  %s1692_s30 = sphi %s1765_s30, %s4092_s30   ;;  %s1688_s1 = sphi %s1763_s1, %s4097_s1   ;;  %s1684_s0 = sphi %s1761_s0, %s4096_s0  }
  0x14   : > { %4035 = sst [smem:[#allocation19_spill]] %s1704_s7  ;;  %s1379_s12 = sadd.s32 4294967294, %s1716_s10  }
  0x15   : > { %4036 = sst [smem:[#allocation20_spill]] %s1716_s10  ;;  %p104_p0 = scmp.ne.s32.totalorder %s1700_s2, %s1696_s6 }
  0x16   : > { %p1807_p1 = scmp.eq.s32.totalorder %s1378_s11, 0  ;;  %p129_p2 = scmp.ne.s32.totalorder %s1692_s30, %s1688_s1 }
  0x17   : > { %p130_p4 = scmp.eq.s32.totalorder %s1378_s11, 1  ;;  %p135_p5 = scmp.ne.s32.totalorder %s1688_s1, %s1684_s0 }
  0x18   : > { %p1815_p3 = por %p1807_p1, %p104_p0  ;;  %p136_p6 = scmp.eq.s32.totalorder %s1379_s12, 1 }
  0x19   : > { %p1821_p7 = por %p130_p4, %p129_p2  ;;  %p1380_p8 = scmp.ge.s32.totalorder %s1716_s10, 1 }
  0x1a   : > { %p1826_p9 = por %p136_p6, %p135_p5  ;;  %p143_p10 = scmp.lt.s32.totalorder %s1716_s10, 3 }
  0x1b   : > { %s4041_s3 = sld [smem:[#allocation24_spill]]  ;;  %s1721_s21 = smov [#allocation6]  }
  0x1c   : > { %p1834_p11 = pnand %p1380_p8, %p143_p10  ;;  %s160_s22 = sshll.u32 %s1721_s21, 4  ;;  %s161_s22 = int_to_ptr.vmem [resolvable:$true] %s160_s22 }
  0x1d   : > { %s52_s23 = sadd.s32 1, %s1712_s9  ;;  %s83_s24 = sld [smem:[#allocation4 + %s1712_s9]] }
  0x1e   : > { %p1414_p13 = pneg %p1834_p11  ;;  %p54_p2 = scmp.ge.s32.totalorder %s52_s23, 2 }
  0x1f   : > { %p98_p4 = scmp.ne.s32.totalorder %s1704_s7, %s1700_s2  ;;  %s119_s25 = sadd.s32 1, %s1692_s30 }
  0x20   : > { %p1415_p0 = pnand %p1414_p13, %p1807_p1  ;;  %s4103_s23 = smov (%p54_p2, %s52_s23), 0 }
  0x21   : > { %s158_s19 = sshll.u32 %s4041_s3, 4  ;;  %4043 = sst [smem:[#allocation21_spill]] %s4103_s23  ;;  %s159_s19 = int_to_ptr.hbm [resolvable:$true] %s158_s19 }
  0x22   : > { %1417 = dma.hbm_to_vmem [thread:$0]  (!%p1415_p0), %s159_s19, 64, %s161_s22, [#allocation7]  }
  0x23   : > { %p99_p5 = scmp.eq.s32.totalorder %s1716_s10, 0  ;;  %s85_s26 = sld [smem:[#allocation4 + %s4103_s23]] }
  0x24   : > { %s86_s27 = ssub.s32 %s1712_s9, %s4103_s23  ;;  %p1429_p10 = scmp.lt.s32.totalorder %s1716_s10, 2 }
  0x25   : > { %p117_p6 = scmp.eq.s32.totalorder %s86_s27, 0  ;;  %p1854_p8 = por %p99_p5, %p98_p4 }
  0x26   : > { %s91_s12 = sadd.s32 1, %s1704_s7  ;;  %s171_s18 = sand.u32 1, %s1704_s7  }
  0x27   : > { %s1860_s29 = scalar_select %p117_p6, %s1692_s30, %s119_s25  }
  0x28   : > { %p1864_p13 = pnand %p1429_p10, %p1854_p8  ;;  %s1383_s25 = sshll.u32 %s171_s18, 3 }
  0x29   : > { %4045 = sst [smem:[#allocation22_spill]] %s1860_s29  ;;  %s87_s11 = ssub.s32 %s83_s24, %s85_s26 }
  0x2a   : > { %s88_s17 = sor.u32 %s87_s11, %s86_s27  ;;  %s1385_s23 = sshll.u32 %s1712_s9, 1 }
  0x2b   : > { %p89_p0 = scmp.eq.s32.totalorder %s88_s17, 0  ;;  %s175_s30 = scalar_lea.vmem [#allocation9], %s1383_s25 }
  0x2c   : > { %s1406_s19 = scalar_select %p1854_p8, [#allocation4], [#allocation12] }
  0x2d   : > { %s1873_s21 = scalar_select %p89_p0, %s1704_s7, %s91_s12  }
  0x2e   : > { %s1407_s22 = scalar_select %p1854_p8, %s1712_s9, 0 }
  0x2f   : > { %4047 = sst [smem:[#allocation23_spill]] %s1873_s21  ;;  %s4105_s19 = smov (!%p1429_p10, %s1406_s19), [#allocation13] }
  0x30   : > { %s4107_s22 = smov (!%p1429_p10, %s1407_s22), 0  ;;  %s188_s10 = sshll.u32 %s175_s30, 4  ;;  %s189_s10 = int_to_ptr.vmem [resolvable:$true] %s188_s10 }
  0x31   : > { %s177_s3 = sld [smem:[%s4105_s19 + %s4107_s22]]  ;;  %s172_s28 = scalar_lea.sflag [#allocation10], %s171_s18 }
  0x32   : > { %p1578_p4 = pneg %p1864_p13 }
  0x37   : > { %s1384_s29 = sshll.u32 %s177_s3, 1 }
  0x38   : > { %s182_s24 = sadd.s32 %s1385_s23, %s1384_s29  ;;  %s1581_s23 = scalar_lea.hbm %s3993_s4, 16 }
  0x39   : > { %s1386_s26 = sshll.u32 %s182_s24, 2 }
  0x3a   : > { %s184_s17 = scalar_lea.hbm %s3993_s4, %s1386_s26 }
  0x3b   : > { %s186_s12 = sshll.u32 %s184_s17, 4  ;;  %s187_s12 = int_to_ptr.hbm [resolvable:$true] %s186_s12 }
  0x3c   : > { %s1574_s21 = sshra.s32 %s187_s12, 4  ;;  %s1575_s21 = int_to_ptr.hbm [resolvable:$true] %s1574_s21 }
  0x3d   : > { %s1576_s7 = scalar_lea.hbm %s1575_s21, 8  ;;  %p1582_p8 = scmp.lt.s32.totalorder %s1575_s21, %s3993_s4 }
  0x3e   : > { %p1577_p2 = scmp.ne.s32.totalorder %s1575_s21, %s1576_s7  ;;  %p1583_p10 = scmp.lt.s32.totalorder %s1581_s23, %s1576_s7 }
  0x40   : > { %p1579_p5 = pnand %p1578_p4, %p1577_p2  ;;  %p1584_p0 = por %p1583_p10, %p1582_p8 }
  0x42   : > { %p1580_p6 = pneg %p1579_p5 }
  0x44   : > { %p1585_p12 = pnand %p1584_p0, %p1580_p6 }
  0x46   : > { %1588 = shalt.err (!%p1585_p12)
}
  0x47   : > { %1423 = dma.hbm_to_vmem [thread:$0]  (!%p1864_p13), %s187_s12, 128, %s189_s10, %s172_s28  }
  0x48   : > { %197 = sbr.rel (%p1834_p11) target bundleno = 478 (0x1de), region = 28 }
  0x4d   : > { %1671 = dma.done.wait (%p1807_p1), [#allocation7], 64  }
  0x4e   : > { %1673 = vsyncadd (%p1807_p1), [#allocation7], 4294967232  ;;  %s204_s18 = sand.u32 1, %s1700_s2  }
  0x4f   : > { %s1899_s21 = sshll.u32 %s204_s18, 3  ;;  %s205_s7 = scalar_lea.sflag [#allocation10], %s204_s18 }
  0x50   : > { %s208_s22 = scalar_lea.vmem [#allocation9], %s1899_s21 }
  0x51   : > { %1675 = dma.done.wait (%p1815_p3), %s205_s7, 128  }
  0x52   : > { %1677 = vsyncadd (%p1815_p3), %s205_s7, 4294967168  ;;  %s235_s10 = smul.u32 6, %s1708_s8  ;;  %v247_v1 = vld [vmem:[#allocation6] sm:$0xf]  ;;  %s315_s14 = sld [smem:[#allocation4 + %s1708_s8]]  ;;  %v333_v36 = vlaneseq }
  0x53   : > { %s227_s30 = sand.u32 1, %s1688_s1   ;;  %s1399_s29 = sshll.u32 %s1708_s8, 3 }
  0x54   : > { %s236_s20 = sld [smem:[#allocation3 + %s235_s10]]  ;;  %s237_s6 = sadd.s32 1, %s235_s10  ;;  %v1921_v44 = vshrl.u32 %v333_v36, 7 }
  0x55   : > { %s238_s25 = sld [smem:[#allocation3 + %s237_s6]]  ;;  %s239_s13 = sadd.s32 2, %s235_s10 }
  0x56   : > { %s240_s24 = sld [smem:[#allocation3 + %s239_s13]]  ;;  %s241_s26 = sadd.s32 3, %s235_s10  ;;  %v1928_v51 = vadd.s32 96, %v1921_v44  ;;  %v1931_v52 = vadd.s32 104, %v1921_v44  ;;  %v1934_v53 = vadd.s32 112, %v1921_v44  ;;  %v1937_v56 = vadd.s32 120, %v1921_v44 }
  0x57   : > { %s242_s27 = sld [smem:[#allocation3 + %s241_s26]]  ;;  %s243_s11 = sadd.s32 4, %s235_s10  ;;  %v1940_v57 = vadd.s32 240, %v1921_v44  ;;  %v1943_v60 = vadd.s32 232, %v1921_v44  ;;  %v1946_v61 = vadd.s32 248, %v1921_v44 }
  0x58   : > { %s244_s17 = sld [smem:[#allocation3 + %s243_s11]]  ;;  %s245_s12 = sadd.s32 5, %s235_s10 }
  0x59   : > { %s246_s28 = sld [smem:[#allocation3 + %s245_s12]]  ;;  %s1393_s3 = sshll.u32 %s315_s14, 8 }
  0x5a   : > { %v248_v0 = vstv %s236_s20  ;;  %v319_v35 = vstv %s1393_s3  ;;  %s1390_s23 = sshll.u32 %s227_s30, 3  ;;  %s1275_s21 = scalar_lea.hbm %s3994_s5, %s1399_s29 }
  0x5b   : > { %v250_v2 = vstv %s238_s25  ;;  %v249_v3 = vmul.f32 %v248_v0, %v247_v1  ;;  %s229_s7 = scalar_lea.vmem [#allocation11], %s1390_s23  ;;  %s1279_s10 = sshll.u32 %s1275_s21, 4  ;;  %s1280_s10 = int_to_ptr.hbm [resolvable:$true] %s1279_s10 }
  0x5c   : > { %v251_v4 = vmul.f32 %v250_v2, %v247_v1  ;;  %v257_v8 = vstv %s240_s24  ;;  %s1262_s20 = scalar_lea.sflag [#allocation8], %s227_s30  ;;  %s1618_s8 = sshra.s32 %s1280_s10, 4  ;;  %s1619_s8 = int_to_ptr.hbm [resolvable:$true] %s1618_s8 }
  0x5d   : > { %v259_v5 = vstv %s242_s27  ;;  %s1620_s6 = scalar_lea.hbm %s1619_s8, 8  ;;  %s1624_s24 = scalar_lea.hbm %s3994_s5, 16 }
  0x5e   : > { %v1391_v6 = vrot.slane %v251_v4, 9  ;;  %v261_v7 = vstv %s244_s17  ;;  %v260_v9 = vmul.f32 %v259_v5, %v247_v1  ;;  %p1621_p1 = scmp.ne.s32.totalorder %s1619_s8, %s1620_s6  ;;  %p1625_p12 = scmp.lt.s32.totalorder %s1619_s8, %s3994_s5 }
  0x5f   : > { %v262_v10 = vmul.f32 %v261_v7, %v247_v1  ;;  %v268_v14 = vstv %s246_s28  ;;  %v1951_v7 = vadd.s32 224, %v1921_v44  ;;  %p1626_p13 = scmp.lt.s32.totalorder %s1624_s24, %s1620_s6 }
  0x60   : > { %v256_v11 = vadd.f32 %v1391_v6, %v249_v3  ;;  %p1622_p3 = pnand %p1621_p1, %p1821_p7 }
  0x61   : > { %v1392_v12 = vrot.slane %v262_v10, 9  ;;  %v1954_v10 = vadd.s32 88, %v1921_v44  ;;  %p1627_p2 = por %p1626_p13, %p1625_p12 }
  0x62   : > { %v258_v13 = vadd.f32 %v257_v8, %v256_v11  ;;  %v1957_v11 = vadd.s32 216, %v1921_v44  ;;  %p1623_p11 = pneg %p1622_p3 }
  0x63   : > { %v267_v15 = vadd.f32 %v1392_v12, %v260_v9 }
  0x64   : > { %v270_v16 = vadd.f32 1.0, %v258_v13  ;;  %p1628_p4 = pnand %p1627_p2, %p1623_p11 }
  0x65   : > { %v269_v17 = vadd.f32 %v268_v14, %v267_v15  ;;  %v1960_v14 = vadd.s32 80, %v1921_v44  ;;  %v1963_v15 = vadd.s32 208, %v1921_v44 }
  0x66   : > { %v271_v18 = vmul.f32 7.5, %v270_v16 }
  0x67   : > { %v272_v19 = vadd.f32 1.0, %v269_v17 }
  0x68   : > { %v274_v20 = vmax.f32 %v271_v18, -2.0 }
  0x69   : > { %v273_v21 = vmul.f32 7.5, %v272_v19 }
  0x6a   : > { %v275_v22 = vmin.f32 %v274_v20, 17.0 }
  0x6b   : > { %v276_v23 = vmax.f32 %v273_v21, -2.0 }
  0x6c   : > { %v278_v24 = vfloor.f32 %v275_v22 }
  0x6d   : > { %v277_v25 = vmin.f32 %v276_v23, 17.0 }
  0x6e   : > { %v1401_v26 = vcvt.f32.s32 %v278_v24  ;;  %v280_v31 = vsub.f32 %v275_v22, %v278_v24 }
  0x6f   : > { %v279_v27 = vfloor.f32 %v277_v25 }
  0x70   : > { %v284_v28 = vadd.s32 1, %v1401_v26  ;;  %vm289_vm0 = vcmp.ge.s32.totalorder %v1401_v26, 0  ;;  %vm290_vm1 = vcmp.lt.s32.totalorder %v1401_v26, 16  ;;  %v287_v37 = vsub.f32 1.0, %v280_v31 }
  0x71   : > { %v1403_v29 = vcvt.f32.s32 %v279_v27  ;;  %vm1908_vm2 = vmand %vm289_vm0, %vm290_vm1  ;;  %v281_v32 = vsub.f32 %v277_v25, %v279_v27  ;;  %v1989_v27 = vadd.s32 200, %v1921_v44 }
  0x72   : > { %vm298_vm3 = vcmp.ge.s32.totalorder %v284_v28, 0  ;;  %vm299_vm4 = vcmp.lt.s32.totalorder %v284_v28, 16 }
  0x73   : > { %v285_v33 = vadd.s32 1, %v1403_v29  ;;  %vm292_vm5 = vcmp.ge.s32.totalorder %v1403_v29, 0  ;;  %v317_v34 = vmul.u32 16, %v1403_v29  ;;  %vm300_vm7 = vmand %vm298_vm3, %vm299_vm4  ;;  %vm294_vm8 = vcmp.lt.s32.totalorder %v1403_v29, 16 }
  0x74   : > { %vm293_vm6 = vmand %vm1908_vm2, %vm292_vm5  ;;  %v286_v39 = vsub.f32 1.0, %v281_v32  ;;  %v304_v46 = vmul.f32 %v287_v37, %v281_v32  ;;  %v310_v47 = vmul.f32 %v281_v32, %v280_v31 }
  0x75   : > { %vm305_vm9 = vcmp.ge.s32.totalorder %v285_v33, 0  ;;  %v318_v38 = vadd.s32 %v1401_v26, %v317_v34  ;;  %vm1915_vm10 = vmand %vm293_vm6, %vm294_vm8  ;;  %vm307_vm13 = vcmp.lt.s32.totalorder %v285_v33, 16  ;;  %v1986_v26 = vadd.s32 72, %v1921_v44 }
  0x76   : > { %vm301_vm11 = vmand %vm300_vm7, %vm292_vm5  ;;  %v288_v42 = vmul.f32 %v287_v37, %v286_v39  ;;  %v297_v45 = vmul.f32 %v286_v39, %v280_v31  ;;  %vm640_vm5 = vcmp.lt.s32.totalorder %v1921_v44, 1 }
  0x77   : > { %v320_v41 = vsub.s32 %v318_v38, %v319_v35  ;;  %vm306_vm12 = vmand %vm1908_vm2, %vm305_vm9 }
  0x78   : > { %vm311_vm14 = vmand %vm300_vm7, %vm305_vm9  ;;  %v296_v50 = vsel %vm1915_vm10, %v288_v42, 0.0 }
  0x79   : > { %vm321_vm15 = vcmp.lt.s32.totalorder %v320_v41, 0  ;;  %v322_v43 = vsub.s32 0, %v320_v41  ;;  %vm302_vm0 = vmand %vm301_vm11, %vm294_vm8  ;;  %v435_v63 = vperm.slane %v296_v50, 0  ;;  %v436_v0 = vperm.slane %v296_v50, 2 }
  0x7a   : > { %vm308_vm1 = vmand %vm306_vm12, %vm307_vm13  ;;  %v303_v54 = vsel %vm302_vm0, %v297_v45, 0.0 }
  0x7b   : > { %v323_v48 = vsel %vm321_vm15, %v322_v43, %v320_v41  ;;  %vm312_vm3 = vmand %vm311_vm14, %vm307_vm13  ;;  %v309_v58 = vsel %vm308_vm1, %v304_v46, 0.0  ;;  %v506_v1 = vperm.slane %v303_v54, 0  ;;  %v507_v3 = vperm.slane %v303_v54, 2 }
  0x7c   : > { %v325_v49 = vand.u32 255, %v323_v48  ;;  %v313_v59 = vsel %vm312_vm3, %v310_v47, 0.0  ;;  %v770_v4 = vperm.slane %v309_v58, 0  ;;  %v771_v5 = vperm.slane %v309_v58, 2 }
  0x7d   : > { %v906_v6 = vperm.slane %v313_v59, 2  ;;  %v905_v9 = vperm.slane %v313_v59, 0  ;;  %v1965_v16 = vperm.slane %v435_v63, 0  ;;  %v1967_v17 = vperm.slane %v436_v0, 0 }
  0x7e   : > { %v326_v55 = vsub.s32 0, %v325_v49  ;;  %v1969_v18 = vperm.slane %v506_v1, 0  ;;  %v1971_v19 = vperm.slane %v507_v3, 0  ;;  %v1975_v21 = vperm.slane %v770_v4, 0 }
  0x7f   : > { %v1977_v22 = vperm.slane %v771_v5, 0  ;;  %v1979_v23 = vperm.slane %v906_v6, 0  ;;  %v1983_v25 = vperm.slane %v905_v9, 0 }
  0x80   : > { %v327_v62 = vsel %vm321_vm15, %v326_v55, %v325_v49 }
  0x81   : > { %vm328_vm2 = vcmp.ne.s32.totalorder %v327_v62, 0  ;;  %vm329_vm4 = vcmp.lt.s32.totalorder %v327_v62, 0  ;;  %v331_v2 = vadd.s32 256, %v327_v62 }
  0x82   : > { %vm330_vm6 = vmand %vm329_vm4, %vm328_vm2 }
  0x83   : > { %v332_v8 = vsel %vm330_vm6, %v331_v2, %v327_v62 }
  0x84   : > { %v366_v12 = vperm.slane %v332_v8, 0  ;;  %v367_v13 = vperm.slane %v332_v8, 2 }
  0x86   : > { %v1973_v20 = vperm.slane %v367_v13, 0  ;;  %v1981_v24 = vperm.slane %v366_v12, 0 }
  0x88   : > { %vm395_vm7 = vcmp.eq.s32.totalorder %v1928_v51, %v1973_v20  ;;  %vm397_vm8 = vcmp.eq.s32.totalorder %v1931_v52, %v1973_v20  ;;  %vm4003_vm9 = vcmp.eq.s32.totalorder %v1934_v53, %v1973_v20  ;;  %vm401_vm10 = vcmp.eq.s32.totalorder %v1937_v56, %v1973_v20 }
  0x89   : > { %v472_v28 = vsel %vm401_vm10, %v1967_v17, 0.0  ;;  %v2007_v29 = vsel %vm397_vm8, %v1971_v19, 0.0  ;;  %v541_v30 = vsel %vm4003_vm9, %v1971_v19, 0.0  ;;  %v2017_v31 = vsel %vm401_vm10, %v1971_v19, 0.0 }
  0x8a   : > { %v605_v32 = vrot.slane %v541_v30, 7  ;;  %v4009_v33 = vrot.slane %v2017_v31, 7  ;;  %v803_v34 = vsel %vm397_vm8, %v1977_v22, 0.0  ;;  %v936_v35 = vsel %vm395_vm7, %v1979_v23, 0.0 }
  0x8b   : > { %v2032_v36 = vsel %vm397_vm8, %v1979_v23, 0.0  ;;  %v1000_v37 = vrot.slane %v936_v35, 7  ;;  %vm427_vm11 = vcmp.eq.s32.totalorder %v1951_v7, %v1973_v20  ;;  %vm429_vm12 = vcmp.eq.s32.totalorder %v1943_v60, %v1973_v20 }
  0x8c   : > { %v674_v38 = vsel %vm640_vm5, %v605_v32, %v4009_v33  ;;  %v4007_v39 = vrot.slane %v2032_v36, 7  ;;  %vm4004_vm13 = vcmp.eq.s32.totalorder %v1940_v57, %v1973_v20  ;;  %vm433_vm14 = vcmp.eq.s32.totalorder %v1946_v61, %v1973_v20 }
  0x8d   : > { %v736_v40 = vadd.f32 %v674_v38, %v472_v28  ;;  %v504_v41 = vsel %vm433_vm14, %v1967_v17, 0.0  ;;  %v2055_v42 = vsel %vm429_vm12, %v1971_v19, 0.0  ;;  %v573_v43 = vsel %vm4004_vm13, %v1971_v19, 0.0 }
  0x8e   : > { %v1076_v45 = vsel %vm640_vm5, %v1000_v37, %v4007_v39  ;;  %v2069_v46 = vsel %vm433_vm14, %v1971_v19, 0.0  ;;  %v637_v47 = vrot.slane %v573_v43, 7  ;;  %v835_v48 = vsel %vm429_vm12, %v1977_v22, 0.0 }
  0x8f   : > { %v871_v49 = vadd.f32 %v803_v34, %v736_v40  ;;  %v4013_v50 = vrot.slane %v2069_v46, 7  ;;  %v968_v54 = vsel %vm427_vm11, %v1979_v23, 0.0  ;;  %v2084_v55 = vsel %vm429_vm12, %v1979_v23, 0.0 }
  0x90   : > { %v1032_v58 = vrot.slane %v968_v54, 7  ;;  %v4011_v59 = vrot.slane %v2084_v55, 7  ;;  %vm393_vm15 = vcmp.eq.s32.totalorder %v1954_v10, %v1973_v20  ;;  %v470_v62 = vsel %vm4003_vm9, %v1967_v17, 0.0 }
  0x91   : > { %v1134_v63 = vadd.f32 %v1076_v45, %v871_v49  ;;  %v642_v0 = vsel %vm640_vm5, %v637_v47, %v4013_v50  ;;  %v603_v1 = vrot.slane %v2007_v29, 7  ;;  %v801_v2 = vsel %vm395_vm7, %v1977_v22, 0.0 }
  0x92   : > { %v768_v3 = vadd.f32 %v642_v0, %v504_v41  ;;  %v1044_v4 = vsel %vm640_vm5, %v1032_v58, %v4011_v59  ;;  %v934_v5 = vsel %vm393_vm15, %v1979_v23, 0.0  ;;  %vm425_vm0 = vcmp.eq.s32.totalorder %v1957_v11, %v1973_v20 }
  0x93   : > { %1214 = vmatpush.msra.mxu2 %v1134_v63  ;;  %v676_v6 = vsel %vm640_vm5, %v603_v1, %v605_v32  ;;  %v998_v8 = vrot.slane %v934_v5, 7  ;;  %v502_v9 = vsel %vm4004_vm13, %v1967_v17, 0.0  ;;  %v635_v12 = vrot.slane %v2055_v42, 7 }
  0x94   : > { %v903_v13 = vadd.f32 %v835_v48, %v768_v3  ;;  %v734_v28 = vadd.f32 %v676_v6, %v470_v62  ;;  %v833_v29 = vsel %vm427_vm11, %v1977_v22, 0.0  ;;  %v966_v30 = vsel %vm425_vm0, %v1979_v23, 0.0 }
  0x95   : > { %v1078_v32 = vsel %vm640_vm5, %v998_v8, %v1000_v37  ;;  %v644_v34 = vsel %vm640_vm5, %v635_v12, %v637_v47  ;;  %v1030_v35 = vrot.slane %v966_v30, 7  ;;  %vm391_vm1 = vcmp.eq.s32.totalorder %v1960_v14, %v1973_v20 }
  0x96   : > { %v1166_v38 = vadd.f32 %v1044_v4, %v903_v13  ;;  %v869_v40 = vadd.f32 %v801_v2, %v734_v28  ;;  %v766_v41 = vadd.f32 %v644_v34, %v502_v9  ;;  %v468_v42 = vsel %vm397_vm8, %v1967_v17, 0.0 }
  0x97   : > { %v1046_v43 = vsel %vm640_vm5, %v1030_v35, %v1032_v58  ;;  %v537_v37 = vsel %vm395_vm7, %v1971_v19, 0.0  ;;  %v799_v45 = vsel %vm393_vm15, %v1977_v22, 0.0  ;;  %v932_v47 = vsel %vm391_vm1, %v1979_v23, 0.0 }
  0x98   : > { %1234 = vmatpush.msra.mxu3 %v1166_v38  ;;  %v1132_v48 = vadd.f32 %v1078_v32, %v869_v40  ;;  %v901_v49 = vadd.f32 %v833_v29, %v766_v41  ;;  %v601_v54 = vrot.slane %v537_v37, 7  ;;  %v996_v58 = vrot.slane %v932_v47, 7 }
  0x99   : > { %vm423_vm3 = vcmp.eq.s32.totalorder %v1963_v15, %v1973_v20  ;;  %v500_v62 = vsel %vm429_vm12, %v1967_v17, 0.0  ;;  %v569_v63 = vsel %vm427_vm11, %v1971_v19, 0.0  ;;  %v831_v0 = vsel %vm425_vm0, %v1977_v22, 0.0 }
  0x9a   : > { %1215 = vmatpush.msra.mxu2 %v1132_v48  ;;  %v1164_v2 = vadd.f32 %v1046_v43, %v901_v49  ;;  %v678_v3 = vsel %vm640_vm5, %v601_v54, %v603_v1  ;;  %v1080_v4 = vsel %vm640_vm5, %v996_v58, %v998_v8  ;;  %v633_v5 = vrot.slane %v569_v63, 7 }
  0x9b   : > { %v732_v6 = vadd.f32 %v678_v3, %v468_v42  ;;  %v964_v9 = vsel %vm423_vm3, %v1979_v23, 0.0  ;;  %vm389_vm2 = vcmp.eq.s32.totalorder %v1986_v26, %v1973_v20  ;;  %v466_v13 = vsel %vm395_vm7, %v1967_v17, 0.0 }
  0x9c   : > { %1235 = vmatpush.msra.mxu3 %v1164_v2  ;;  %v646_v1 = vsel %vm640_vm5, %v633_v5, %v635_v12  ;;  %v1028_v8 = vrot.slane %v964_v9, 7  ;;  %v2185_v28 = vsel %vm393_vm15, %v1971_v19, 0.0  ;;  %v797_v29 = vsel %vm391_vm1, %v1977_v22, 0.0 }
  0x9d   : > { %v867_v30 = vadd.f32 %v799_v45, %v732_v6  ;;  %v764_v32 = vadd.f32 %v646_v1, %v500_v62  ;;  %v599_v34 = vrot.slane %v2185_v28, 7  ;;  %v2196_v12 = vsel %vm389_vm2, %v1979_v23, 0.0 }
  0x9e   : > { %v1048_v38 = vsel %vm640_vm5, %v1028_v8, %v1030_v35  ;;  %v994_v40 = vrot.slane %v2196_v12, 7  ;;  %vm421_vm4 = vcmp.eq.s32.totalorder %v1989_v27, %v1973_v20  ;;  %v498_v41 = vsel %vm427_vm11, %v1967_v17, 0.0 }
  0x9f   : > { %v1130_v42 = vadd.f32 %v1080_v4, %v867_v30  ;;  %v899_v43 = vadd.f32 %v831_v0, %v764_v32  ;;  %v680_v37 = vsel %vm640_vm5, %v599_v34, %v601_v54  ;;  %v2215_v35 = vsel %vm425_vm0, %v1971_v19, 0.0 }
  0xa0   : > { %v730_v45 = vadd.f32 %v680_v37, %v466_v13  ;;  %v1082_v47 = vsel %vm640_vm5, %v994_v40, %v996_v58  ;;  %v631_v48 = vrot.slane %v2215_v35, 7  ;;  %v829_v49 = vsel %vm423_vm3, %v1977_v22, 0.0 }
  0xa1   : > { %1216 = vmatpush.msra.mxu2 %v1130_v42  ;;  %v1162_v54 = vadd.f32 %v1048_v38, %v899_v43  ;;  %v2230_v62 = vsel %vm421_vm4, %v1979_v23, 0.0  ;;  %vm394_vm6 = vcmp.eq.s32.totalorder %v1928_v51, %v1981_v24  ;;  %vm396_vm7 = vcmp.eq.s32.totalorder %v1931_v52, %v1981_v24 }
  0xa2   : > { %v865_v58 = vadd.f32 %v797_v29, %v730_v45  ;;  %v648_v63 = vsel %vm640_vm5, %v631_v48, %v633_v5  ;;  %v1026_v0 = vrot.slane %v2230_v62, 7  ;;  %vm4015_vm8 = vcmp.eq.s32.totalorder %v1934_v53, %v1981_v24 }
  0xa3   : > { %1236 = vmatpush.msra.mxu3 %v1162_v54  ;;  %v762_v2 = vadd.f32 %v648_v63, %v498_v41  ;;  %vm4002_vm11 = vcmp.eq.s32.totalorder %v1937_v56, %v1981_v24  ;;  %v2249_v3 = vsel %vm396_vm7, %v1969_v18, 0.0  ;;  %v2255_v4 = vsel %vm4015_vm8, %v1969_v18, 0.0 }
  0xa4   : > { %v1128_v5 = vadd.f32 %v1082_v47, %v865_v58  ;;  %v1050_v6 = vsel %vm640_vm5, %v1026_v0, %v1028_v8  ;;  %v471_v9 = vsel %vm4002_vm11, %v1965_v16, 0.0  ;;  %v2269_v13 = vsel %vm4002_vm11, %v1969_v18, 0.0 }
  0xa5   : > { %v897_v1 = vadd.f32 %v829_v49, %v762_v2  ;;  %v604_v29 = vrot.slane %v2255_v4, 7  ;;  %v4006_v30 = vrot.slane %v2269_v13, 7  ;;  %v802_v8 = vsel %vm396_vm7, %v1975_v21, 0.0 }
  0xa6   : > { %1217 = vmatpush.msra.mxu2 %v1128_v5  ;;  %v2281_v32 = vsel %vm394_vm6, %v1983_v25, 0.0  ;;  %v2287_v38 = vsel %vm396_vm7, %v1983_v25, 0.0  ;;  %vm426_vm12 = vcmp.eq.s32.totalorder %v1951_v7, %v1981_v24  ;;  %vm428_vm11 = vcmp.eq.s32.totalorder %v1943_v60, %v1981_v24 }
  0xa7   : > { %v1160_v41 = vadd.f32 %v1050_v6, %v897_v1  ;;  %v673_v42 = vsel %vm640_vm5, %v604_v29, %v4006_v30  ;;  %v4014_v43 = vrot.slane %v2281_v32, 7  ;;  %v4005_v37 = vrot.slane %v2287_v38, 7 }
  0xa8   : > { %v735_v45 = vadd.f32 %v673_v42, %v471_v9  ;;  %vm4017_vm9 = vcmp.eq.s32.totalorder %v1940_v57, %v1981_v24  ;;  %vm4008_vm13 = vcmp.eq.s32.totalorder %v1946_v61, %v1981_v24  ;;  %v2309_v47 = vsel %vm428_vm11, %v1969_v18, 0.0 }
  0xa9   : > { %1237 = vmatpush.msra.mxu3 %v1160_v41  ;;  %v1075_v49 = vsel %vm640_vm5, %v4014_v43, %v4005_v37  ;;  %v503_v54 = vsel %vm4008_vm13, %v1965_v16, 0.0  ;;  %v2325_v58 = vsel %vm4017_vm9, %v1969_v18, 0.0  ;;  %v2331_v63 = vsel %vm4008_vm13, %v1969_v18, 0.0 }
  0xaa   : > { %v870_v2 = vadd.f32 %v802_v8, %v735_v45  ;;  %v636_v5 = vrot.slane %v2325_v58, 7  ;;  %v4010_v6 = vrot.slane %v2331_v63, 7  ;;  %v834_v9 = vsel %vm428_vm11, %v1975_v21, 0.0 }
  0xab   : > { %v2343_v1 = vsel %vm426_vm12, %v1983_v25, 0.0  ;;  %v2349_v8 = vsel %vm428_vm11, %v1983_v25, 0.0  ;;  %v2352_v41 = vadd.s32 64, %v1921_v44  ;;  %v464_v42 = vsel %vm393_vm15, %v1967_v17, 0.0 }
  0xac   : > { %v1133_v45 = vadd.f32 %v1075_v49, %v870_v2  ;;  %v641_v58 = vsel %vm640_vm5, %v636_v5, %v4010_v6  ;;  %v1031_v37 = vrot.slane %v2343_v1, 7  ;;  %v4012_v30 = vrot.slane %v2349_v8, 7 }
  0xad   : > { %v767_v39 = vadd.f32 %v641_v58, %v503_v54  ;;  %vm387_vm13 = vcmp.eq.s32.totalorder %v2352_v41, %v1973_v20  ;;  %v533_v33 = vsel %vm391_vm1, %v1971_v19, 0.0  ;;  %v795_v49 = vsel %vm389_vm2, %v1977_v22, 0.0 }
  0xae   : > { %1174 = vmatpush.msra.mxu0 %v1133_v45  ;;  %v1043_v2 = vsel %vm640_vm5, %v1031_v37, %v4012_v30  ;;  %v597_v54 = vrot.slane %v533_v33, 7  ;;  %v2382_v1 = vsel %vm387_vm13, %v1979_v23, 0.0  ;;  %v2385_v58 = vadd.s32 192, %v1921_v44 }
  0xaf   : > { %v902_v6 = vadd.f32 %v834_v9, %v767_v39  ;;  %v992_v59 = vrot.slane %v2382_v1, 7  ;;  %v496_v45 = vsel %vm425_vm0, %v1967_v17, 0.0  ;;  %v2396_v33 = vsel %vm423_vm3, %v1971_v19, 0.0 }
  0xb0   : > { %v682_v30 = vsel %vm640_vm5, %v597_v54, %v599_v34  ;;  %vm419_vm15 = vcmp.eq.s32.totalorder %v2385_v58, %v1973_v20  ;;  %v629_v39 = vrot.slane %v2396_v33, 7  ;;  %v827_v9 = vsel %vm421_vm4, %v1977_v22, 0.0 }
  0xb1   : > { %v1165_v1 = vadd.f32 %v1043_v2, %v902_v6  ;;  %v728_v50 = vadd.f32 %v682_v30, %v464_v42  ;;  %v1084_v28 = vsel %vm640_vm5, %v992_v59, %v994_v40  ;;  %v2417_v34 = vsel %vm419_vm15, %v1979_v23, 0.0 }
  0xb2   : > { %v650_v43 = vsel %vm640_vm5, %v629_v39, %v631_v48  ;;  %v4016_v30 = vrot.slane %v2417_v34, 7  ;;  %vm392_vm0 = vcmp.eq.s32.totalorder %v1954_v10, %v1981_v24  ;;  %v469_v12 = vsel %vm4015_vm8, %v1965_v16, 0.0 }
  0xb3   : > { %1194 = vmatpush.msra.mxu1 %v1165_v1  ;;  %v863_v40 = vadd.f32 %v795_v49, %v728_v50  ;;  %v760_v6 = vadd.f32 %v650_v43, %v496_v45  ;;  %v602_v35 = vrot.slane %v2249_v3, 7  ;;  %v800_v48 = vsel %vm394_vm6, %v1975_v21, 0.0 }
  0xb4   : > { %v1052_v42 = vsel %vm640_vm5, %v4016_v30, %v1026_v0  ;;  %v2447_v50 = vsel %vm392_vm0, %v1983_v25, 0.0  ;;  %vm424_vm8 = vcmp.eq.s32.totalorder %v1957_v11, %v1981_v24  ;;  %v501_v43 = vsel %vm4017_vm9, %v1965_v16, 0.0 }
  0xb5   : > { %v1126_v62 = vadd.f32 %v1084_v28, %v863_v40  ;;  %v895_v49 = vadd.f32 %v827_v9, %v760_v6  ;;  %v675_v0 = vsel %vm640_vm5, %v602_v35, %v604_v29  ;;  %v997_v2 = vrot.slane %v2447_v50, 7 }
  0xb6   : > { %v733_v45 = vadd.f32 %v675_v0, %v469_v12  ;;  %v634_v1 = vrot.slane %v2309_v47, 7  ;;  %v832_v30 = vsel %vm426_vm12, %v1975_v21, 0.0  ;;  %v2471_v4 = vsel %vm424_vm8, %v1983_v25, 0.0 }
  0xb7   : > { %1218 = vmatpush.msra.mxu2 %v1126_v62  ;;  %v1158_v9 = vadd.f32 %v1052_v42, %v895_v49  ;;  %v4052_v29 = vrot.slane %v2281_v32, 7  ;;  %v1029_v47 = vrot.slane %v2471_v4, 7  ;;  %v2479_v12 = vadd.s32 56, %v1921_v44 }
  0xb8   : > { %v868_v40 = vadd.f32 %v800_v48, %v733_v45  ;;  %v643_v6 = vsel %vm640_vm5, %v634_v1, %v636_v5  ;;  %v462_v50 = vsel %vm391_vm1, %v1967_v17, 0.0  ;;  %v2491_v32 = vsel %vm389_vm2, %v1971_v19, 0.0 }
  0xb9   : > { %v1077_v28 = vsel %vm640_vm5, %v997_v2, %v4052_v29  ;;  %1238 = vmatpush.msra.mxu3 %v1158_v9  ;;  %v765_v42 = vadd.f32 %v643_v6, %v501_v43  ;;  %v1045_v48 = vsel %vm640_vm5, %v1029_v47, %v1031_v37  ;;  %vm385_vm9 = vcmp.eq.s32.totalorder %v2479_v12, %v1973_v20 }
  0xba   : > { %v595_v5 = vrot.slane %v2491_v32, 7  ;;  %v1131_v62 = vadd.f32 %v1077_v28, %v868_v40  ;;  %v793_v49 = vsel %vm387_vm13, %v1977_v22, 0.0  ;;  %v2508_v43 = vsel %vm385_vm9, %v1979_v23, 0.0 }
  0xbb   : > { %v2511_v0 = vadd.s32 184, %v1921_v44  ;;  %v900_v37 = vadd.f32 %v832_v30, %v765_v42  ;;  %v990_v9 = vrot.slane %v2508_v43, 7  ;;  %v494_v29 = vsel %vm423_vm3, %v1967_v17, 0.0 }
  0xbc   : > { %v684_v45 = vsel %vm640_vm5, %v595_v5, %v597_v54  ;;  %1175 = vmatpush.msra.mxu0 %v1131_v62  ;;  %v2526_v30 = vsel %vm421_vm4, %v1971_v19, 0.0  ;;  %v825_v54 = vsel %vm419_vm15, %v1977_v22, 0.0  ;;  %vm390_vm3 = vcmp.eq.s32.totalorder %v1960_v14, %v1981_v24 }
  0xbd   : > { %v726_v28 = vadd.f32 %v684_v45, %v462_v50  ;;  %vm417_vm1 = vcmp.eq.s32.totalorder %v2511_v0, %v1973_v20  ;;  %v1163_v40 = vadd.f32 %v1045_v48, %v900_v37  ;;  %v1086_v6 = vsel %vm640_vm5, %v990_v9, %v992_v59 }
  0xbe   : > { %v627_v50 = vrot.slane %v2526_v30, 7  ;;  %v2539_v32 = vsel %vm417_vm1, %v1979_v23, 0.0  ;;  %v467_v48 = vsel %vm396_vm7, %v1965_v16, 0.0  ;;  %v798_v52 = vsel %vm392_vm0, %v1975_v21, 0.0 }
  0xbf   : > { %v861_v42 = vadd.f32 %v793_v49, %v726_v28  ;;  %v1022_v62 = vrot.slane %v2539_v32, 7  ;;  %1195 = vmatpush.msra.mxu1 %v1163_v40  ;;  %v2558_v49 = vsel %vm394_vm6, %v1969_v18, 0.0  ;;  %v2568_v33 = vsel %vm390_vm3, %v1983_v25, 0.0 }
  0xc0   : > { %v652_v59 = vsel %vm640_vm5, %v627_v50, %v629_v39  ;;  %v4053_v39 = vrot.slane %v2417_v34, 7  ;;  %v600_v28 = vrot.slane %v2558_v49, 7  ;;  %v995_v40 = vrot.slane %v2568_v33, 7 }
  0xc1   : > { %v1124_v43 = vadd.f32 %v1086_v6, %v861_v42  ;;  %v758_v37 = vadd.f32 %v652_v59, %v494_v29  ;;  %vm422_vm7 = vcmp.eq.s32.totalorder %v1963_v15, %v1981_v24  ;;  %v499_v6 = vsel %vm428_vm11, %v1965_v16, 0.0 }
  0xc2   : > { %v1054_v45 = vsel %vm640_vm5, %v1022_v62, %v4053_v39  ;;  %v2588_v34 = vsel %vm426_vm12, %v1969_v18, 0.0  ;;  %v677_v42 = vsel %vm640_vm5, %v600_v28, %v602_v35  ;;  %v830_v60 = vsel %vm424_vm8, %v1975_v21, 0.0 }
  0xc3   : > { %1219 = vmatpush.msra.mxu2 %v1124_v43  ;;  %v893_v29 = vadd.f32 %v825_v54, %v758_v37  ;;  %v4019_v59 = vrot.slane %v2588_v34, 7  ;;  %v731_v49 = vadd.f32 %v677_v42, %v467_v48  ;;  %v1079_v39 = vsel %vm640_vm5, %v995_v40, %v997_v2 }
  0xc4   : > { %v2607_v3 = vsel %vm422_vm7, %v1983_v25, 0.0  ;;  %v2610_v35 = vadd.s32 48, %v1921_v44  ;;  %v460_v2 = vsel %vm389_vm2, %v1967_v17, 0.0  ;;  %v2726_v32 = vsel %vm424_vm8, %v1969_v18, 0.0 }
  0xc5   : > { %v1156_v54 = vadd.f32 %v1054_v45, %v893_v29  ;;  %v645_v48 = vsel %vm640_vm5, %v4019_v59, %v634_v1  ;;  %v4018_v43 = vrot.slane %v2607_v3, 7  ;;  %v866_v37 = vadd.f32 %v798_v52, %v731_v49 }
  0xc6   : > { %v763_v42 = vadd.f32 %v645_v48, %v499_v6  ;;  %vm383_vm11 = vcmp.eq.s32.totalorder %v2610_v35, %v1973_v20  ;;  %v2627_v45 = vsel %vm387_vm13, %v1971_v19, 0.0  ;;  %v791_v6 = vsel %vm385_vm9, %v1977_v22, 0.0 }
  0xc7   : > { %1239 = vmatpush.msra.mxu3 %v1156_v54  ;;  %v1047_v1 = vsel %vm640_vm5, %v4018_v43, %v1029_v47  ;;  %v593_v52 = vrot.slane %v2627_v45, 7  ;;  %v2644_v29 = vsel %vm383_vm11, %v1979_v23, 0.0  ;;  %v1129_v49 = vadd.f32 %v1079_v39, %v866_v37 }
  0xc8   : > { %v898_v4 = vadd.f32 %v830_v60, %v763_v42  ;;  %v988_v54 = vrot.slane %v2644_v29, 7  ;;  %v2648_v48 = vadd.s32 176, %v1921_v44  ;;  %v492_v45 = vsel %vm421_vm4, %v1967_v17, 0.0 }
  0xc9   : > { %v686_v47 = vsel %vm640_vm5, %v593_v52, %v595_v5  ;;  %v2660_v43 = vsel %vm419_vm15, %v1971_v19, 0.0  ;;  %v823_v60 = vsel %vm417_vm1, %v1977_v22, 0.0  ;;  %1176 = vmatpush.msra.mxu0 %v1129_v49  ;;  %vm388_vm4 = vcmp.eq.s32.totalorder %v1986_v26, %v1981_v24 }
  0xca   : > { %v1161_v39 = vadd.f32 %v1047_v1, %v898_v4  ;;  %v724_v37 = vadd.f32 %v686_v47, %v460_v2  ;;  %v1088_v5 = vsel %vm640_vm5, %v988_v54, %v990_v9  ;;  %vm415_vm2 = vcmp.eq.s32.totalorder %v2648_v48, %v1973_v20 }
  0xcb   : > { %v625_v42 = vrot.slane %v2660_v43, 7  ;;  %v2677_v59 = vsel %vm415_vm2, %v1979_v23, 0.0  ;;  %v465_v2 = vsel %vm394_vm6, %v1965_v16, 0.0  ;;  %v2690_v43 = vsel %vm392_vm0, %v1969_v18, 0.0 }
  0xcc   : > { %1196 = vmatpush.msra.mxu1 %v1161_v39  ;;  %v859_v9 = vadd.f32 %v791_v6, %v724_v37  ;;  %v1020_v1 = vrot.slane %v2677_v59, 7  ;;  %v796_v49 = vsel %vm390_vm3, %v1975_v21, 0.0  ;;  %v4021_v6 = vrot.slane %v2690_v43, 7 }
  0xcd   : > { %v654_v51 = vsel %vm640_vm5, %v625_v42, %v627_v50  ;;  %v2705_v59 = vsel %vm388_vm4, %v1983_v25, 0.0  ;;  %vm420_vm6 = vcmp.eq.s32.totalorder %v1989_v27, %v1981_v24  ;;  %v497_v37 = vsel %vm426_vm12, %v1965_v16, 0.0 }
  0xce   : > { %v1122_v4 = vadd.f32 %v1088_v5, %v859_v9  ;;  %v756_v47 = vadd.f32 %v654_v51, %v492_v45  ;;  %v1056_v30 = vsel %vm640_vm5, %v1020_v1, %v1022_v62  ;;  %v4020_v50 = vrot.slane %v2705_v59, 7 }
  0xcf   : > { %v679_v39 = vsel %vm640_vm5, %v4021_v6, %v600_v28  ;;  %v828_v62 = vsel %vm422_vm7, %v1975_v21, 0.0  ;;  %v630_v28 = vrot.slane %v2726_v32, 7  ;;  %v2743_v9 = vsel %vm420_vm6, %v1983_v25, 0.0 }
  0xd0   : > { %1220 = vmatpush.msra.mxu2 %v1122_v4  ;;  %v891_v45 = vadd.f32 %v823_v60, %v756_v47  ;;  %v729_v5 = vadd.f32 %v679_v39, %v465_v2  ;;  %v1081_v7 = vsel %vm640_vm5, %v4020_v50, %v995_v40  ;;  %v2746_v51 = vadd.s32 40, %v1921_v44 }
  0xd1   : > { %v458_v33 = vsel %vm387_vm13, %v1967_v17, 0.0  ;;  %v2756_v40 = vsel %vm385_vm9, %v1971_v19, 0.0  ;;  %v4054_v4 = vrot.slane %v2588_v34, 7  ;;  %v1025_v39 = vrot.slane %v2743_v9, 7 }
  0xd2   : > { %v1154_v60 = vadd.f32 %v1056_v30, %v891_v45  ;;  %v864_v2 = vadd.f32 %v796_v49, %v729_v5  ;;  %vm381_vm12 = vcmp.eq.s32.totalorder %v2746_v51, %v1973_v20  ;;  %v591_v50 = vrot.slane %v2756_v40, 7 }
  0xd3   : > { %v647_v47 = vsel %vm640_vm5, %v630_v28, %v4054_v4  ;;  %v789_v6 = vsel %vm383_vm11, %v1977_v22, 0.0  ;;  %v4055_v34 = vrot.slane %v2607_v3, 7  ;;  %v2781_v45 = vadd.s32 168, %v1921_v44 }
  0xd4   : > { %v761_v32 = vadd.f32 %v647_v47, %v497_v37  ;;  %1240 = vmatpush.msra.mxu3 %v1154_v60  ;;  %v1127_v49 = vadd.f32 %v1081_v7, %v864_v2  ;;  %v2778_v37 = vsel %vm381_vm12, %v1979_v23, 0.0  ;;  %v688_v7 = vsel %vm640_vm5, %v591_v50, %v593_v52 }
  0xd5   : > { %v1049_v30 = vsel %vm640_vm5, %v1025_v39, %v4055_v34  ;;  %v986_v3 = vrot.slane %v2778_v37, 7  ;;  %v490_v9 = vsel %vm419_vm15, %v1967_v17, 0.0  ;;  %v722_v60 = vadd.f32 %v688_v7, %v458_v33 }
  0xd6   : > { %v896_v5 = vadd.f32 %v828_v62, %v761_v32  ;;  %1177 = vmatpush.msra.mxu0 %v1127_v49  ;;  %vm413_vm13 = vcmp.eq.s32.totalorder %v2781_v45, %v1973_v20  ;;  %v2798_v62 = vsel %vm417_vm1, %v1971_v19, 0.0  ;;  %v821_v52 = vsel %vm415_vm2, %v1977_v22, 0.0 }
  0xd7   : > { %v1090_v33 = vsel %vm640_vm5, %v986_v3, %v988_v54  ;;  %v623_v4 = vrot.slane %v2798_v62, 7  ;;  %v2813_v47 = vsel %vm413_vm13, %v1979_v23, 0.0  ;;  %v857_v32 = vadd.f32 %v789_v6, %v722_v60 }
  0xd8   : > { %v1159_v2 = vadd.f32 %v1049_v30, %v896_v5  ;;  %v1018_v49 = vrot.slane %v2813_v47, 7  ;;  %vm386_vm15 = vcmp.eq.s32.totalorder %v2352_v41, %v1981_v24  ;;  %v463_v29 = vsel %vm392_vm0, %v1965_v16, 0.0 }
  0xd9   : > { %v656_v54 = vsel %vm640_vm5, %v623_v4, %v625_v42  ;;  %v2830_v6 = vsel %vm390_vm3, %v1969_v18, 0.0  ;;  %v794_v34 = vsel %vm388_vm4, %v1975_v21, 0.0  ;;  %v2840_v10 = vsel %vm386_vm15, %v1983_v25, 0.0 }
  0xda   : > { %1197 = vmatpush.msra.mxu1 %v1159_v2  ;;  %v1120_v30 = vadd.f32 %v1090_v33, %v857_v32  ;;  %v754_v37 = vadd.f32 %v656_v54, %v490_v9  ;;  %v1058_v42 = vsel %vm640_vm5, %v1018_v49, %v1020_v1  ;;  %v596_v5 = vrot.slane %v2830_v6, 7 }
  0xdb   : > { %v991_v7 = vrot.slane %v2840_v10, 7  ;;  %vm418_vm0 = vcmp.eq.s32.totalorder %v2385_v58, %v1981_v24  ;;  %v495_v60 = vsel %vm424_vm8, %v1965_v16, 0.0  ;;  %v2858_v9 = vsel %vm422_vm7, %v1969_v18, 0.0 }
  0xdc   : > { %1221 = vmatpush.msra.mxu2 %v1120_v30  ;;  %v889_v1 = vadd.f32 %v821_v52, %v754_v37  ;;  %v4056_v2 = vrot.slane %v2690_v43, 7  ;;  %v4022_v32 = vrot.slane %v2858_v9, 7  ;;  %v826_v11 = vsel %vm420_vm6, %v1975_v21, 0.0 }
  0xdd   : > { %v4057_v6 = vrot.slane %v2705_v59, 7  ;;  %v2879_v43 = vsel %vm418_vm0, %v1983_v25, 0.0  ;;  %v2882_v30 = vadd.s32 32, %v1921_v44  ;;  %v2998_v47 = vsel %vm420_vm6, %v1969_v18, 0.0 }
  0xde   : > { %v681_v33 = vsel %vm640_vm5, %v596_v5, %v4056_v2  ;;  %v1152_v37 = vadd.f32 %v1058_v42, %v889_v1  ;;  %v649_v59 = vsel %vm640_vm5, %v4022_v32, %v630_v28  ;;  %v456_v2 = vsel %vm385_vm9, %v1967_v17, 0.0 }
  0xdf   : > { %v727_v54 = vadd.f32 %v681_v33, %v463_v29  ;;  %v1083_v52 = vsel %vm640_vm5, %v991_v7, %v4057_v6  ;;  %v4023_v29 = vrot.slane %v2879_v43, 7  ;;  %v759_v6 = vadd.f32 %v649_v59, %v495_v60 }
  0xe0   : > { %vm379_vm8 = vcmp.eq.s32.totalorder %v2882_v30, %v1973_v20  ;;  %v2899_v42 = vsel %vm383_vm11, %v1971_v19, 0.0  ;;  %1241 = vmatpush.msra.mxu3 %v1152_v37  ;;  %v2918_v32 = vadd.s32 160, %v1921_v44  ;;  %v454_v10 = vsel %vm383_vm11, %v1967_v17, 0.0 }
  0xe1   : > { %v862_v33 = vadd.f32 %v794_v34, %v727_v54  ;;  %v1051_v28 = vsel %vm640_vm5, %v4023_v29, %v1025_v39  ;;  %v589_v1 = vrot.slane %v2899_v42, 7  ;;  %v787_v34 = vsel %vm381_vm12, %v1977_v22, 0.0 }
  0xe2   : > { %v2914_v60 = vsel %vm379_vm8, %v1979_v23, 0.0  ;;  %v894_v37 = vadd.f32 %v826_v11, %v759_v6  ;;  %v488_v42 = vsel %vm417_vm1, %v1967_v17, 0.0  ;;  %v2932_v11 = vsel %vm415_vm2, %v1971_v19, 0.0 }
  0xe3   : > { %v1125_v54 = vadd.f32 %v1083_v52, %v862_v33  ;;  %v984_v59 = vrot.slane %v2914_v60, 7  ;;  %v690_v39 = vsel %vm640_vm5, %v589_v1, %v591_v50  ;;  %v819_v52 = vsel %vm413_vm13, %v1977_v22, 0.0 }
  0xe4   : > { %v1157_v40 = vadd.f32 %v1051_v28, %v894_v37  ;;  %v720_v33 = vadd.f32 %v690_v39, %v456_v2  ;;  %vm411_vm9 = vcmp.eq.s32.totalorder %v2918_v32, %v1973_v20  ;;  %v621_v6 = vrot.slane %v2932_v11, 7 }
  0xe5   : > { %1178 = vmatpush.msra.mxu0 %v1125_v54  ;;  %v1092_v50 = vsel %vm640_vm5, %v984_v59, %v986_v3  ;;  %v2949_v29 = vsel %vm411_vm9, %v1979_v23, 0.0  ;;  %vm384_vm1 = vcmp.eq.s32.totalorder %v2479_v12, %v1981_v24  ;;  %v461_v2 = vsel %vm390_vm3, %v1965_v16, 0.0 }
  0xe6   : > { %1198 = vmatpush.msra.mxu1 %v1157_v40  ;;  %v855_v3 = vadd.f32 %v787_v34, %v720_v33  ;;  %v1016_v28 = vrot.slane %v2949_v29, 7  ;;  %v2962_v54 = vsel %vm388_vm4, %v1969_v18, 0.0  ;;  %v792_v37 = vsel %vm386_vm15, %v1975_v21, 0.0 }
  0xe7   : > { %v658_v14 = vsel %vm640_vm5, %v621_v6, %v623_v4  ;;  %v4025_v34 = vrot.slane %v2962_v54, 7  ;;  %v2977_v29 = vsel %vm384_vm1, %v1983_v25, 0.0  ;;  %vm416_vm3 = vcmp.eq.s32.totalorder %v2511_v0, %v1981_v24 }
  0xe8   : > { %v1118_v39 = vadd.f32 %v1092_v50, %v855_v3  ;;  %v752_v11 = vadd.f32 %v658_v14, %v488_v42  ;;  %v1060_v62 = vsel %vm640_vm5, %v1016_v28, %v1018_v49  ;;  %v4024_v4 = vrot.slane %v2977_v29, 7 }
  0xe9   : > { %v683_v40 = vsel %vm640_vm5, %v4025_v34, %v596_v5  ;;  %v493_v33 = vsel %vm422_vm7, %v1965_v16, 0.0  ;;  %v824_v49 = vsel %vm418_vm0, %v1975_v21, 0.0  ;;  %v626_v5 = vrot.slane %v2998_v47, 7 }
  0xea   : > { %1222 = vmatpush.msra.mxu2 %v1118_v39  ;;  %v887_v42 = vadd.f32 %v819_v52, %v752_v11  ;;  %v725_v50 = vadd.f32 %v683_v40, %v461_v2  ;;  %v1085_v15 = vsel %vm640_vm5, %v4024_v4, %v991_v7  ;;  %v3015_v3 = vsel %vm416_vm3, %v1983_v25, 0.0 }
  0xeb   : > { %v3018_v14 = vadd.s32 24, %v1921_v44  ;;  %v3028_v7 = vsel %vm381_vm12, %v1971_v19, 0.0  ;;  %v4058_v39 = vrot.slane %v2858_v9, 7  ;;  %v1021_v40 = vrot.slane %v3015_v3, 7 }
  0xec   : > { %v1150_v52 = vadd.f32 %v1060_v62, %v887_v42  ;;  %v860_v2 = vadd.f32 %v792_v37, %v725_v50  ;;  %v587_v4 = vrot.slane %v3028_v7, 7  ;;  %v785_v34 = vsel %vm379_vm8, %v1977_v22, 0.0 }
  0xed   : > { %v651_v11 = vsel %vm640_vm5, %v626_v5, %v4058_v39  ;;  %vm377_vm7 = vcmp.eq.s32.totalorder %v3018_v14, %v1973_v20  ;;  %v4059_v9 = vrot.slane %v2879_v43, 7  ;;  %v3053_v42 = vadd.s32 152, %v1921_v44 }
  0xee   : > { %v757_v47 = vadd.f32 %v651_v11, %v493_v33  ;;  %1242 = vmatpush.msra.mxu3 %v1150_v52  ;;  %v1123_v37 = vadd.f32 %v1085_v15, %v860_v2  ;;  %v3050_v33 = vsel %vm377_vm7, %v1979_v23, 0.0  ;;  %v692_v15 = vsel %vm640_vm5, %v587_v4, %v589_v1 }
  0xef   : > { %v1053_v62 = vsel %vm640_vm5, %v1021_v40, %v4059_v9  ;;  %v982_v43 = vrot.slane %v3050_v33, 7  ;;  %v486_v3 = vsel %vm415_vm2, %v1967_v17, 0.0  ;;  %v718_v52 = vadd.f32 %v692_v15, %v454_v10 }
  0xf0   : > { %v892_v50 = vadd.f32 %v824_v49, %v757_v47  ;;  %1179 = vmatpush.msra.mxu0 %v1123_v37  ;;  %vm409_vm11 = vcmp.eq.s32.totalorder %v3053_v42, %v1973_v20  ;;  %v3070_v49 = vsel %vm413_vm13, %v1971_v19, 0.0  ;;  %v817_v1 = vsel %vm411_vm9, %v1977_v22, 0.0 }
  0xf1   : > { %v1094_v10 = vsel %vm640_vm5, %v982_v43, %v984_v59  ;;  %v619_v39 = vrot.slane %v3070_v49, 7  ;;  %v3085_v11 = vsel %vm409_vm11, %v1979_v23, 0.0  ;;  %v853_v47 = vadd.f32 %v785_v34, %v718_v52 }
  0xf2   : > { %v1155_v2 = vadd.f32 %v1053_v62, %v892_v50  ;;  %v1014_v37 = vrot.slane %v3085_v11, 7  ;;  %vm382_vm2 = vcmp.eq.s32.totalorder %v2610_v35, %v1981_v24  ;;  %v459_v60 = vsel %vm388_vm4, %v1965_v16, 0.0 }
  0xf3   : > { %v660_v59 = vsel %vm640_vm5, %v619_v39, %v621_v6  ;;  %v3102_v34 = vsel %vm386_vm15, %v1969_v18, 0.0  ;;  %v790_v9 = vsel %vm384_vm1, %v1975_v21, 0.0  ;;  %v3112_v26 = vsel %vm382_vm2, %v1983_v25, 0.0 }
  0xf4   : > { %1199 = vmatpush.msra.mxu1 %v1155_v2  ;;  %v1116_v62 = vadd.f32 %v1094_v10, %v853_v47  ;;  %v750_v33 = vadd.f32 %v660_v59, %v486_v3  ;;  %v1062_v6 = vsel %vm640_vm5, %v1014_v37, %v1016_v28  ;;  %v592_v50 = vrot.slane %v3102_v34, 7 }
  0xf5   : > { %v987_v15 = vrot.slane %v3112_v26, 7  ;;  %vm414_vm4 = vcmp.eq.s32.totalorder %v2648_v48, %v1981_v24  ;;  %v491_v52 = vsel %vm420_vm6, %v1965_v16, 0.0  ;;  %v3130_v3 = vsel %vm418_vm0, %v1969_v18, 0.0 }
  0xf6   : > { %1223 = vmatpush.msra.mxu2 %v1116_v62  ;;  %v885_v28 = vadd.f32 %v817_v1, %v750_v33  ;;  %v4060_v2 = vrot.slane %v2962_v54, 7  ;;  %v4026_v47 = vrot.slane %v3130_v3, 7  ;;  %v822_v27 = vsel %vm416_vm3, %v1975_v21, 0.0 }
  0xf7   : > { %v4061_v34 = vrot.slane %v2977_v29, 7  ;;  %v3151_v54 = vsel %vm414_vm4, %v1983_v25, 0.0  ;;  %v3154_v62 = vadd.s32 16, %v1921_v44  ;;  %v3270_v11 = vsel %vm416_vm3, %v1969_v18, 0.0 }
  0xf8   : > { %v685_v10 = vsel %vm640_vm5, %v592_v50, %v4060_v2  ;;  %v1148_v33 = vadd.f32 %v1062_v6, %v885_v28  ;;  %v653_v29 = vsel %vm640_vm5, %v4026_v47, %v626_v5  ;;  %v452_v2 = vsel %vm381_vm12, %v1967_v17, 0.0 }
  0xf9   : > { %v723_v59 = vadd.f32 %v685_v10, %v459_v60  ;;  %v1087_v1 = vsel %vm640_vm5, %v987_v15, %v4061_v34  ;;  %v4027_v60 = vrot.slane %v3151_v54, 7  ;;  %v755_v34 = vadd.f32 %v653_v29, %v491_v52 }
  0xfa   : > { %vm375_vm6 = vcmp.eq.s32.totalorder %v3154_v62, %v1973_v20  ;;  %v3171_v6 = vsel %vm379_vm8, %v1971_v19, 0.0  ;;  %1243 = vmatpush.msra.mxu3 %v1148_v33  ;;  %v3190_v47 = vadd.s32 144, %v1921_v44  ;;  %v450_v26 = vsel %vm379_vm8, %v1967_v17, 0.0 }
  0xfb   : > { %v858_v10 = vadd.f32 %v790_v9, %v723_v59  ;;  %v1055_v5 = vsel %vm640_vm5, %v4027_v60, %v1021_v40  ;;  %v585_v28 = vrot.slane %v3171_v6, 7  ;;  %v783_v9 = vsel %vm377_vm7, %v1977_v22, 0.0 }
  0xfc   : > { %v3186_v52 = vsel %vm375_vm6, %v1979_v23, 0.0  ;;  %v890_v33 = vadd.f32 %v822_v27, %v755_v34  ;;  %v484_v6 = vsel %vm413_vm13, %v1967_v17, 0.0  ;;  %v3204_v27 = vsel %vm411_vm9, %v1971_v19, 0.0 }
  0xfd   : > { %v1121_v59 = vadd.f32 %v1087_v1, %v858_v10  ;;  %v980_v29 = vrot.slane %v3186_v52, 7  ;;  %v694_v40 = vsel %vm640_vm5, %v585_v28, %v587_v4  ;;  %v815_v1 = vsel %vm409_vm11, %v1977_v22, 0.0 }
  0xfe   : > { %v1153_v7 = vadd.f32 %v1055_v5, %v890_v33  ;;  %v716_v10 = vadd.f32 %v694_v40, %v452_v2  ;;  %vm407_vm12 = vcmp.eq.s32.totalorder %v3190_v47, %v1973_v20  ;;  %v617_v34 = vrot.slane %v3204_v27, 7 }
  0xff   : > { %1180 = vmatpush.msra.mxu0 %v1121_v59  ;;  %v1096_v4 = vsel %vm640_vm5, %v980_v29, %v982_v43  ;;  %v3221_v60 = vsel %vm407_vm12, %v1979_v23, 0.0  ;;  %vm380_vm13 = vcmp.eq.s32.totalorder %v2746_v51, %v1981_v24  ;;  %v457_v2 = vsel %vm386_vm15, %v1965_v16, 0.0 }
 0x100   : > { %1200 = vmatpush.msra.mxu1 %v1153_v7  ;;  %v851_v43 = vadd.f32 %v783_v9, %v716_v10  ;;  %v1012_v5 = vrot.slane %v3221_v60, 7  ;;  %v3234_v59 = vsel %vm384_vm1, %v1969_v18, 0.0  ;;  %v788_v33 = vsel %vm382_vm2, %v1975_v21, 0.0 }
 0x101   : > { %v662_v41 = vsel %vm640_vm5, %v617_v34, %v619_v39  ;;  %v4029_v9 = vrot.slane %v3234_v59, 7  ;;  %v3249_v60 = vsel %vm380_vm13, %v1983_v25, 0.0  ;;  %vm412_vm15 = vcmp.eq.s32.totalorder %v2781_v45, %v1981_v24 }
 0x102   : > { %v1114_v40 = vadd.f32 %v1096_v4, %v851_v43  ;;  %v748_v27 = vadd.f32 %v662_v41, %v484_v6  ;;  %v1064_v49 = vsel %vm640_vm5, %v1012_v5, %v1014_v37  ;;  %v4028_v39 = vrot.slane %v3249_v60, 7 }
 0x103   : > { %v687_v7 = vsel %vm640_vm5, %v4029_v9, %v592_v50  ;;  %v489_v10 = vsel %vm418_vm0, %v1965_v16, 0.0  ;;  %v820_v37 = vsel %vm414_vm4, %v1975_v21, 0.0  ;;  %v622_v50 = vrot.slane %v3270_v11, 7 }
 0x104   : > { %1224 = vmatpush.msra.mxu2 %v1114_v40  ;;  %v883_v6 = vadd.f32 %v815_v1, %v748_v27  ;;  %v721_v4 = vadd.f32 %v687_v7, %v457_v2  ;;  %v1089_v58 = vsel %vm640_vm5, %v4028_v39, %v987_v15  ;;  %v3287_v43 = vsel %vm412_vm15, %v1983_v25, 0.0 }
 0x105   : > { %v3290_v41 = vadd.s32 8, %v1921_v44  ;;  %v3300_v15 = vsel %vm377_vm7, %v1971_v19, 0.0  ;;  %v4062_v40 = vrot.slane %v3130_v3, 7  ;;  %v1017_v7 = vrot.slane %v3287_v43, 7 }
 0x106   : > { %v1146_v1 = vadd.f32 %v1064_v49, %v883_v6  ;;  %v856_v2 = vadd.f32 %v788_v33, %v721_v4  ;;  %v583_v39 = vrot.slane %v3300_v15, 7  ;;  %v781_v9 = vsel %vm375_vm6, %v1977_v22, 0.0 }
 0x107   : > { %v655_v27 = vsel %vm640_vm5, %v622_v50, %v4062_v40  ;;  %vm373_vm0 = vcmp.eq.s32.totalorder %v3290_v41, %v1973_v20  ;;  %v4063_v3 = vrot.slane %v3151_v54, 7  ;;  %v3325_v6 = vadd.s32 136, %v1921_v44 }
 0x108   : > { %v753_v11 = vadd.f32 %v655_v27, %v489_v10  ;;  %1244 = vmatpush.msra.mxu3 %v1146_v1  ;;  %v1119_v33 = vadd.f32 %v1089_v58, %v856_v2  ;;  %v3322_v10 = vsel %vm373_vm0, %v1979_v23, 0.0  ;;  %v696_v58 = vsel %vm640_vm5, %v583_v39, %v585_v28 }
 0x109   : > { %v1057_v49 = vsel %vm640_vm5, %v1017_v7, %v4063_v3  ;;  %v978_v54 = vrot.slane %v3322_v10, 7  ;;  %v482_v43 = vsel %vm411_vm9, %v1967_v17, 0.0  ;;  %v714_v1 = vadd.f32 %v696_v58, %v450_v26 }
 0x10a   : > { %v888_v4 = vadd.f32 %v820_v37, %v753_v11  ;;  %1181 = vmatpush.msra.mxu0 %v1119_v33  ;;  %vm405_vm8 = vcmp.eq.s32.totalorder %v3325_v6, %v1973_v20  ;;  %v3342_v37 = vsel %vm409_vm11, %v1971_v19, 0.0  ;;  %v813_v28 = vsel %vm407_vm12, %v1977_v22, 0.0 }
 0x10b   : > { %v1098_v26 = vsel %vm640_vm5, %v978_v54, %v980_v29  ;;  %v615_v40 = vrot.slane %v3342_v37, 7  ;;  %v3357_v27 = vsel %vm405_vm8, %v1979_v23, 0.0  ;;  %v849_v11 = vadd.f32 %v781_v9, %v714_v1 }
 0x10c   : > { %v1151_v2 = vadd.f32 %v1057_v49, %v888_v4  ;;  %v1010_v33 = vrot.slane %v3357_v27, 7  ;;  %vm378_vm9 = vcmp.eq.s32.totalorder %v2882_v30, %v1981_v24  ;;  %v455_v52 = vsel %vm384_vm1, %v1965_v16, 0.0 }
 0x10d   : > { %v664_v29 = vsel %vm640_vm5, %v615_v40, %v617_v34  ;;  %v3374_v9 = vsel %vm382_vm2, %v1969_v18, 0.0  ;;  %v786_v3 = vsel %vm380_vm13, %v1975_v21, 0.0  ;;  %v3384_v12 = vsel %vm378_vm9, %v1983_v25, 0.0 }
 0x10e   : > { %1201 = vmatpush.msra.mxu1 %v1151_v2  ;;  %v1112_v49 = vadd.f32 %v1098_v26, %v849_v11  ;;  %v746_v10 = vadd.f32 %v664_v29, %v482_v43  ;;  %v1066_v34 = vsel %vm640_vm5, %v1010_v33, %v1012_v5  ;;  %v588_v4 = vrot.slane %v3374_v9, 7 }
 0x10f   : > { %v983_v58 = vrot.slane %v3384_v12, 7  ;;  %vm410_vm1 = vcmp.eq.s32.totalorder %v2918_v32, %v1981_v24  ;;  %v487_v1 = vsel %vm416_vm3, %v1965_v16, 0.0  ;;  %v3402_v43 = vsel %vm414_vm4, %v1969_v18, 0.0 }
 0x110   : > { %1225 = vmatpush.msra.mxu2 %v1112_v49  ;;  %v881_v5 = vadd.f32 %v813_v28, %v746_v10  ;;  %v4064_v2 = vrot.slane %v3234_v59, 7  ;;  %v4032_v11 = vrot.slane %v3402_v43, 7  ;;  %v818_v0 = vsel %vm412_vm15, %v1975_v21, 0.0 }
 0x111   : > { %v4065_v9 = vrot.slane %v3249_v60, 7  ;;  %v3423_v59 = vsel %vm410_vm1, %v1983_v25, 0.0  ;;  %vm371_vm3 = vcmp.eq.s32.totalorder %v1921_v44, %v1973_v20  ;;  %v448_v10 = vsel %vm377_vm7, %v1967_v17, 0.0 }
 0x112   : > { %v689_v26 = vsel %vm640_vm5, %v588_v4, %v4064_v2  ;;  %v1144_v49 = vadd.f32 %v1066_v34, %v881_v5  ;;  %v657_v60 = vsel %vm640_vm5, %v4032_v11, %v622_v50  ;;  %v779_v50 = vsel %vm373_vm0, %v1977_v22, 0.0 }
 0x113   : > { %v719_v29 = vadd.f32 %v689_v26, %v455_v52  ;;  %v1091_v28 = vsel %vm640_vm5, %v983_v58, %v4065_v9  ;;  %v4030_v52 = vrot.slane %v3423_v59, 7  ;;  %v751_v26 = vadd.f32 %v657_v60, %v487_v1 }
 0x114   : > { %v3440_v9 = vsel %vm375_vm6, %v1971_v19, 0.0  ;;  %1245 = vmatpush.msra.mxu3 %v1144_v49  ;;  %v3455_v1 = vsel %vm371_vm3, %v1979_v23, 0.0  ;;  %v3458_v5 = vadd.s32 128, %v1921_v44  ;;  %v784_v35 = vsel %vm378_vm9, %v1975_v21, 0.0 }
 0x115   : > { %v854_v2 = vadd.f32 %v786_v3, %v719_v29  ;;  %v1059_v34 = vsel %vm640_vm5, %v4030_v52, %v1017_v7  ;;  %v4031_v3 = vrot.slane %v3440_v9, 7  ;;  %v886_v60 = vadd.f32 %v818_v0, %v751_v26 }
 0x116   : > { %v976_v49 = vrot.slane %v3455_v1, 7  ;;  %v480_v7 = vsel %vm409_vm11, %v1967_v17, 0.0  ;;  %vm403_vm7 = vcmp.eq.s32.totalorder %v3458_v5, %v1973_v20  ;;  %v3477_v0 = vsel %vm407_vm12, %v1971_v19, 0.0 }
 0x117   : > { %v1117_v29 = vadd.f32 %v1091_v28, %v854_v2  ;;  %v698_v52 = vsel %vm640_vm5, %v4031_v3, %v583_v39  ;;  %v811_v28 = vsel %vm405_vm8, %v1977_v22, 0.0  ;;  %v1149_v15 = vadd.f32 %v1059_v34, %v886_v60  ;;  %v1167_v3 = vld [vmem:[%s208_s22] sm:$0xff]  ;;  %s1277_s22 = sshll.u32 %s229_s7, 4  ;;  %s1278_s22 = int_to_ptr.vmem [resolvable:$true] %s1277_s22 }
 0x118   : > { %v712_v2 = vadd.f32 %v698_v52, %v448_v10  ;;  %v1100_v39 = vsel %vm640_vm5, %v976_v49, %v978_v54  ;;  %v613_v26 = vrot.slane %v3477_v0, 7  ;;  %v944_v11 = vsel %vm403_vm7, %v1979_v23, 0.0  ;;  %1169 = vst [vmem:[#allocation1] ss:$2 sm:$0xff] %v1167_v3 }
 0x119   : > { %1182 = vmatpush.msra.mxu0 %v1117_v29  ;;  %vm376_vm11 = vcmp.eq.s32.totalorder %v3018_v14, %v1981_v24  ;;  %v453_v52 = vsel %vm382_vm2, %v1965_v16, 0.0  ;;  %v3504_v54 = vsel %vm380_vm13, %v1969_v18, 0.0  ;;  %1202 = vmatpush.msra.mxu1 %v1149_v15  ;;  %v1008_v29 = vrot.slane %v944_v11, 7 }
 0x11a   : > { %v847_v10 = vadd.f32 %v779_v50, %v712_v2  ;;  %v666_v34 = vsel %vm640_vm5, %v613_v26, %v615_v40  ;;  %v586_v60 = vrot.slane %v3504_v54, 7  ;;  %v3519_v3 = vsel %vm376_vm11, %v1983_v25, 0.0 }
 0x11b   : > { %v744_v0 = vadd.f32 %v666_v34, %v480_v7  ;;  %vm408_vm2 = vcmp.eq.s32.totalorder %v3053_v42, %v1981_v24  ;;  %v1068_v40 = vsel %vm640_vm5, %v1008_v29, %v1010_v33  ;;  %v981_v50 = vrot.slane %v3519_v3, 7 }
 0x11c   : > { %v1110_v37 = vadd.f32 %v1100_v39, %v847_v10  ;;  %v691_v11 = vsel %vm640_vm5, %v586_v60, %v588_v4  ;;  %v485_v2 = vsel %vm414_vm4, %v1965_v16, 0.0  ;;  %v3538_v27 = vsel %vm412_vm15, %v1969_v18, 0.0 }
 0x11d   : > { %v879_v7 = vadd.f32 %v811_v28, %v744_v0  ;;  %v717_v15 = vadd.f32 %v691_v11, %v453_v52  ;;  %v1093_v33 = vsel %vm640_vm5, %v981_v50, %v983_v58  ;;  %v618_v4 = vrot.slane %v3538_v27, 7 }
 0x11e   : > { %1226 = vmatpush.msra.mxu2 %v1110_v37  ;;  %v816_v48 = vsel %vm410_vm1, %v1975_v21, 0.0  ;;  %v949_v28 = vsel %vm408_vm2, %v1983_v25, 0.0  ;;  %v446_v12 = vsel %vm375_vm6, %v1967_v17, 0.0  ;;  %v4066_v58 = vrot.slane %v3402_v43, 7 }
 0x11f   : > { %v1142_v39 = vadd.f32 %v1068_v40, %v879_v7  ;;  %v852_v52 = vadd.f32 %v784_v35, %v717_v15  ;;  %v1013_v54 = vrot.slane %v949_v28, 7  ;;  %v515_v34 = vsel %vm373_vm0, %v1971_v19, 0.0  ;;  %v3798_v14 = vld.sshfl [vmem:[#allocation1] sm:$0xff pattern:$0x75316420] }
 0x120   : > { %v659_v10 = vsel %vm640_vm5, %v618_v4, %v4066_v58  ;;  %v777_v0 = vsel %vm371_vm3, %v1977_v22, 0.0  ;;  %v3573_v35 = vsel %vm433_vm14, %v1979_v23, 0.0  ;;  %v4067_v37 = vrot.slane %v3423_v59, 7 }
 0x121   : > { %1246 = vmatpush.msra.mxu3 %v1142_v39  ;;  %v1115_v43 = vadd.f32 %v1093_v33, %v852_v52  ;;  %v749_v3 = vadd.f32 %v659_v10, %v485_v2  ;;  %v579_v11 = vrot.slane %v515_v34, 7  ;;  %v1038_v7 = vrot.slane %v3573_v35, 7 }
 0x122   : > { %v1061_v40 = vsel %vm640_vm5, %v1013_v54, %v4067_v37  ;;  %v478_v15 = vsel %vm407_vm12, %v1967_v17, 0.0  ;;  %v3588_v27 = vsel %vm405_vm8, %v1971_v19, 0.0  ;;  %v809_v59 = vsel %vm403_vm7, %v1977_v22, 0.0 }
 0x123   : > { %1183 = vmatpush.msra.mxu0 %v1115_v43  ;;  %v884_v2 = vadd.f32 %v816_v48, %v749_v3  ;;  %v4068_v33 = vrot.slane %v3440_v9, 7  ;;  %v611_v39 = vrot.slane %v3588_v27, 7  ;;  %v3603_v52 = vsel %vm401_vm10, %v1979_v23, 0.0 }
 0x124   : > { %v1102_v10 = vsel %vm640_vm5, %v1038_v7, %v976_v49  ;;  %v1006_v48 = vrot.slane %v3603_v52, 7  ;;  %vm374_vm4 = vcmp.eq.s32.totalorder %v3154_v62, %v1981_v24  ;;  %v451_v35 = vsel %vm380_vm13, %v1965_v16, 0.0 }
 0x125   : > { %v700_v28 = vsel %vm640_vm5, %v579_v11, %v4068_v33  ;;  %v1147_v9 = vadd.f32 %v1061_v40, %v884_v2  ;;  %v668_v34 = vsel %vm640_vm5, %v611_v39, %v613_v26  ;;  %v520_v1 = vsel %vm378_vm9, %v1969_v18, 0.0 }
 0x126   : > { %v710_v58 = vadd.f32 %v700_v28, %v446_v12  ;;  %v742_v12 = vadd.f32 %v668_v34, %v478_v15  ;;  %v1070_v43 = vsel %vm640_vm5, %v1006_v48, %v1008_v29  ;;  %v584_v3 = vrot.slane %v520_v1, 7 }
 0x127   : > { %1203 = vmatpush.msra.mxu1 %v1147_v9  ;;  %v782_v26 = vsel %vm376_vm11, %v1975_v21, 0.0  ;;  %v915_v51 = vsel %vm374_vm4, %v1983_v25, 0.0  ;;  %vm406_vm6 = vcmp.eq.s32.totalorder %v3190_v47, %v1981_v24  ;;  %v483_v29 = vsel %vm412_vm15, %v1965_v16, 0.0 }
 0x128   : > { %v845_v49 = vadd.f32 %v777_v0, %v710_v58  ;;  %v877_v37 = vadd.f32 %v809_v59, %v742_v12  ;;  %v693_v40 = vsel %vm640_vm5, %v584_v3, %v586_v60  ;;  %v979_v15 = vrot.slane %v915_v51, 7 }
 0x129   : > { %v715_v27 = vadd.f32 %v693_v40, %v451_v35  ;;  %v552_v2 = vsel %vm410_vm1, %v1969_v18, 0.0  ;;  %v814_v33 = vsel %vm408_vm2, %v1975_v21, 0.0  ;;  %v3652_v45 = vsel %vm406_vm6, %v1983_v25, 0.0 }
 0x12a   : > { %v1108_v0 = vadd.f32 %v1102_v10, %v845_v49  ;;  %v1140_v60 = vadd.f32 %v1070_v43, %v877_v37  ;;  %v1095_v59 = vsel %vm640_vm5, %v979_v15, %v981_v50  ;;  %v616_v28 = vrot.slane %v552_v2, 7 }
 0x12b   : > { %v1011_v52 = vrot.slane %v3652_v45, 7  ;;  %v850_v58 = vadd.f32 %v782_v26, %v715_v27  ;;  %v444_v10 = vsel %vm373_vm0, %v1967_v17, 0.0  ;;  %v513_v9 = vsel %vm371_vm3, %v1971_v19, 0.0 }
 0x12c   : > { %1227 = vmatpush.msra.mxu2 %v1108_v0  ;;  %v839_v34 = vsel %vm433_vm14, %v1977_v22, 0.0  ;;  %1247 = vmatpush.msra.mxu3 %v1140_v60  ;;  %v661_v50 = vsel %vm640_vm5, %v616_v28, %v618_v4  ;;  %v577_v1 = vrot.slane %v513_v9, 7  ;;  %vm4069_vm12 = vcmp.eq.s32.totalorder %v1940_v57, %v1973_v20 }
 0x12d   : > { %v1063_v35 = vsel %vm640_vm5, %v1011_v52, %v1013_v54  ;;  %v972_v49 = vsel %vm4069_vm12, %v1979_v23, 0.0  ;;  %v1113_v12 = vadd.f32 %v1095_v59, %v850_v58  ;;  %v747_v43 = vadd.f32 %v661_v50, %v483_v29  ;;  %vm4072_vm15 = vmmov %vm4069_vm12 }
 0x12e   : > { %v1036_v26 = vrot.slane %v972_v49, 7  ;;  %v476_v51 = vsel %vm405_vm8, %v1967_v17, 0.0  ;;  %v702_v4 = vsel %vm640_vm5, %v577_v1, %v579_v11  ;;  %v545_v54 = vsel %vm403_vm7, %v1971_v19, 0.0 }
 0x12f   : > { %v807_v0 = vsel %vm401_vm10, %v1977_v22, 0.0  ;;  %vm4070_vm14 = vcmp.eq.s32.totalorder %v1934_v53, %v1973_v20  ;;  %1184 = vmatpush.msra.mxu0 %v1113_v12  ;;  %v882_v37 = vadd.f32 %v814_v33, %v747_v43  ;;  %v708_v40 = vadd.f32 %v702_v4, %v444_v10 }
 0x130   : > { %v940_v29 = vsel %vm4070_vm14, %v1979_v23, 0.0  ;;  %v1040_v11 = vsel %vm640_vm5, %v1036_v26, %v1038_v7  ;;  %v609_v27 = vrot.slane %v545_v54, 7  ;;  %vm372_vm13 = vcmp.eq.s32.totalorder %v3290_v41, %v1981_v24  ;;  %vm4075_vm0 = vmmov %vm4070_vm14 }
 0x131   : > { %v1004_v2 = vrot.slane %v940_v29, 7  ;;  %v449_v19 = vsel %vm378_vm9, %v1965_v16, 0.0  ;;  %v3707_v23 = vsel %vm376_vm11, %v1969_v18, 0.0  ;;  %v1145_v33 = vadd.f32 %v1063_v35, %v882_v37 }
 0x132   : > { %v843_v45 = vadd.f32 %v839_v34, %v708_v40  ;;  %v670_v7 = vsel %vm640_vm5, %v609_v27, %v611_v39  ;;  %v582_v60 = vrot.slane %v3707_v23, 7  ;;  %v780_v30 = vsel %vm374_vm4, %v1975_v21, 0.0 }
 0x133   : > { %v740_v59 = vadd.f32 %v670_v7, %v476_v51  ;;  %v1072_v58 = vsel %vm640_vm5, %v1004_v2, %v1006_v48  ;;  %v913_v10 = vsel %vm372_vm13, %v1983_v25, 0.0  ;;  %1204 = vmatpush.msra.mxu1 %v1145_v33  ;;  %vm404_vm10 = vcmp.eq.s32.totalorder %v3325_v6, %v1981_v24 }
 0x134   : > { %v1106_v9 = vadd.f32 %v1040_v11, %v843_v45  ;;  %v695_v39 = vsel %vm640_vm5, %v582_v60, %v584_v3  ;;  %v977_v34 = vrot.slane %v913_v10, 7  ;;  %v481_v35 = vsel %vm410_vm1, %v1965_v16, 0.0 }
 0x135   : > { %v875_v48 = vadd.f32 %v807_v0, %v740_v59  ;;  %v713_v50 = vadd.f32 %v695_v39, %v449_v19  ;;  %v550_v49 = vsel %vm408_vm2, %v1969_v18, 0.0  ;;  %v812_v43 = vsel %vm406_vm6, %v1975_v21, 0.0 }
 0x136   : > { %1228 = vmatpush.msra.mxu2 %v1106_v9  ;;  %v1097_v3 = vsel %vm640_vm5, %v977_v34, %v979_v15  ;;  %v614_v12 = vrot.slane %v550_v49, 7  ;;  %v945_v32 = vsel %vm404_vm10, %v1983_v25, 0.0  ;;  %v442_v0 = vsel %vm371_vm3, %v1967_v17, 0.0 }
 0x137   : > { %v1138_v51 = vadd.f32 %v1072_v58, %v875_v48  ;;  %v848_v4 = vadd.f32 %v780_v30, %v713_v50  ;;  %v1009_v54 = vrot.slane %v945_v32, 7  ;;  %v4071_v29 = vrot.slane %v2069_v46, 7 }
 0x138   : > { %v663_v15 = vsel %vm640_vm5, %v614_v12, %v616_v28  ;;  %v837_v40 = vsel %vm4072_vm15, %v1977_v22, 0.0  ;;  %v4073_v11 = vrot.slane %v2084_v55, 7  ;;  %v4074_v45 = vrot.slane %v2017_v31, 7 }
 0x139   : > { %v704_v37 = vsel %vm640_vm5, %v4071_v29, %v577_v1  ;;  %1248 = vmatpush.msra.mxu3 %v1138_v51  ;;  %v1111_v23 = vadd.f32 %v1097_v3, %v848_v4  ;;  %v745_v33 = vadd.f32 %v663_v15, %v481_v35  ;;  %v1065_v28 = vsel %vm640_vm5, %v1009_v54, %v1011_v52  ;;  %v3810_v35 = vld.sshfl [vmem:[#allocation1 + $0x8] sm:$0xff pattern:$0x75316420] }
 0x13a   : > { %v1042_v19 = vsel %vm640_vm5, %v4073_v11, %v1036_v26  ;;  %v706_v46 = vadd.f32 %v704_v37, %v442_v0  ;;  %v474_v1 = vsel %vm403_vm7, %v1967_v17, 0.0  ;;  %v672_v55 = vsel %vm640_vm5, %v4074_v45, %v609_v27 }
 0x13b   : > { %v805_v26 = vsel %vm4075_vm0, %v1977_v22, 0.0  ;;  %v4076_v7 = vrot.slane %v2032_v36, 7  ;;  %1185 = vmatpush.msra.mxu0 %v1111_v23  ;;  %v880_v59 = vadd.f32 %v812_v43, %v745_v33  ;;  %v738_v30 = vadd.f32 %v672_v55, %v474_v1 }
 0x13c   : > { %v841_v58 = vadd.f32 %v837_v40, %v706_v46  ;;  %vm370_vm8 = vcmp.eq.s32.totalorder %v1921_v44, %v1981_v24  ;;  %v447_v17 = vsel %vm376_vm11, %v1965_v16, 0.0  ;;  %v516_v20 = vsel %vm374_vm4, %v1969_v18, 0.0 }
 0x13d   : > { %v1074_v52 = vsel %vm640_vm5, %v4076_v7, %v1004_v2  ;;  %v778_v22 = vsel %vm372_vm13, %v1975_v21, 0.0  ;;  %v911_v31 = vsel %vm370_vm8, %v1983_v25, 0.0  ;;  %v1143_v36 = vadd.f32 %v1065_v28, %v880_v59 }
 0x13e   : > { %v1104_v27 = vadd.f32 %v1042_v19, %v841_v58  ;;  %v873_v2 = vadd.f32 %v805_v26, %v738_v30  ;;  %v580_v10 = vrot.slane %v516_v20, 7  ;;  %v975_v9 = vrot.slane %v911_v31, 7 }
 0x13f   : > { %vm402_vm9 = vcmp.eq.s32.totalorder %v3458_v5, %v1981_v24  ;;  %v479_v39 = vsel %vm408_vm2, %v1965_v16, 0.0  ;;  %v548_v48 = vsel %vm406_vm6, %v1969_v18, 0.0  ;;  %1205 = vmatpush.msra.mxu1 %v1143_v36  ;;  %v810_v42 = vsel %vm404_vm10, %v1975_v21, 0.0 }
 0x140   : > { %1229 = vmatpush.msra.mxu2 %v1104_v27  ;;  %v1136_v50 = vadd.f32 %v1074_v52, %v873_v2  ;;  %v697_v49 = vsel %vm640_vm5, %v580_v10, %v582_v60  ;;  %v612_v3 = vrot.slane %v548_v48, 7  ;;  %v1099_v32 = vsel %vm640_vm5, %v975_v9, %v977_v34 }
 0x141   : > { %1230 = vmatmul.f32.vlgmr.msra.gmra.mxu2 %v3798_v14  ;;  %v711_v43 = vadd.f32 %v697_v49, %v447_v17  ;;  %v943_v51 = vsel %vm402_vm9, %v1983_v25, 0.0  ;;  %v445_v60 = vsel %vm374_vm4, %v1965_v16, 0.0  ;;  %v514_v34 = vsel %vm372_vm13, %v1969_v18, 0.0 }
 0x142   : > { %1249 = vmatpush.msra.mxu3 %v1136_v50  ;;  %v665_v4 = vsel %vm640_vm5, %v612_v3, %v614_v12  ;;  %v1007_v0 = vrot.slane %v943_v51, 7  ;;  %v776_v15 = vsel %vm370_vm8, %v1975_v21, 0.0  ;;  %v578_v37 = vrot.slane %v514_v34, 7 }
 0x143   : > { %1250 = vmatmul.f32.vlgmr.msra.gmra.mxu3 %v3810_v35  ;;  %v846_v29 = vadd.f32 %v778_v22, %v711_v43  ;;  %v743_v62 = vadd.f32 %v665_v4, %v479_v39  ;;  %vm4077_vm1 = vcmp.eq.s32.totalorder %v1946_v61, %v1981_v24  ;;  %v477_v19 = vsel %vm406_vm6, %v1965_v16, 0.0 }
 0x144   : > { %v973_v12 = vsel %vm4077_vm1, %v1983_v25, 0.0  ;;  %v1067_v40 = vsel %vm640_vm5, %v1007_v0, %v1009_v54  ;;  %v546_v23 = vsel %vm404_vm10, %v1969_v18, 0.0  ;;  %v699_v46 = vsel %vm640_vm5, %v578_v37, %v580_v10  ;;  %vm4079_vm7 = vmmov %vm4077_vm1 }
 0x145   : > { %v1037_v11 = vrot.slane %v973_v12, 7  ;;  %v1109_v33 = vadd.f32 %v1099_v32, %v846_v29  ;;  %v878_v28 = vadd.f32 %v810_v42, %v743_v62  ;;  %v610_v1 = vrot.slane %v546_v23, 7 }
 0x146   : > { %v709_v45 = vadd.f32 %v699_v46, %v445_v60  ;;  %v808_v47 = vsel %vm402_vm9, %v1975_v21, 0.0  ;;  %vm4078_vm3 = vcmp.eq.s32.totalorder %v1937_v56, %v1981_v24  ;;  %v443_v59 = vsel %vm372_vm13, %v1965_v16, 0.0 }
 0x147   : > { %v1101_v54 = vsel %vm640_vm5, %v1037_v11, %v975_v9  ;;  %v941_v55 = vsel %vm4078_vm3, %v1983_v25, 0.0  ;;  %1186 = vmatpush.msra.mxu0 %v1109_v33  ;;  %v1141_v26 = vadd.f32 %v1067_v40, %v878_v28  ;;  %v667_v7 = vsel %vm640_vm5, %v610_v1, %v612_v3  ;;  %vm4081_vm2 = vmmov %vm4078_vm3 }
 0x148   : > { %v1005_v52 = vrot.slane %v941_v55, 7  ;;  %v844_v58 = vadd.f32 %v776_v15, %v709_v45  ;;  %v741_v30 = vadd.f32 %v667_v7, %v477_v19  ;;  %v512_v17 = vsel %vm370_vm8, %v1969_v18, 0.0 }
 0x149   : > { %v838_v20 = vsel %vm4079_vm7, %v1975_v21, 0.0  ;;  %1206 = vmatpush.msra.mxu1 %v1141_v26  ;;  %v576_v31 = vrot.slane %v512_v17, 7  ;;  %vm4080_vm11 = vcmp.eq.s32.totalorder %v1940_v57, %v1981_v24  ;;  %v475_v36 = vsel %vm404_vm10, %v1965_v16, 0.0 }
 0x14a   : > { %v1069_v22 = vsel %vm640_vm5, %v1005_v52, %v1007_v0  ;;  %v971_v41 = vsel %vm4080_vm11, %v1983_v25, 0.0  ;;  %v1107_v27 = vadd.f32 %v1101_v54, %v844_v58  ;;  %v876_v2 = vadd.f32 %v808_v47, %v741_v30  ;;  %vm4084_vm6 = vmmov %vm4080_vm11 }
 0x14b   : > { %v1035_v10 = vrot.slane %v971_v41, 7  ;;  %v544_v61 = vsel %vm402_vm9, %v1969_v18, 0.0  ;;  %v701_v9 = vsel %vm640_vm5, %v576_v31, %v578_v37  ;;  %v806_v48 = vsel %vm4081_vm2, %v1975_v21, 0.0 }
 0x14c   : > { %v608_v39 = vrot.slane %v544_v61, 7  ;;  %vm4082_vm4 = vcmp.eq.s32.totalorder %v1934_v53, %v1981_v24  ;;  %1187 = vmatpush.msra.mxu0 %v1107_v27  ;;  %v1139_v50 = vadd.f32 %v1069_v22, %v876_v2  ;;  %v707_v49 = vadd.f32 %v701_v9, %v443_v59 }
 0x14d   : > { %v939_v6 = vsel %vm4082_vm4, %v1983_v25, 0.0  ;;  %v1039_v18 = vsel %vm640_vm5, %v1035_v10, %v1037_v11  ;;  %v441_v56 = vsel %vm370_vm8, %v1965_v16, 0.0  ;;  %v4083_v43 = vrot.slane %v2331_v63, 7  ;;  %vm4087_vm12 = vmmov %vm4082_vm4 }
 0x14e   : > { %v1003_v3 = vrot.slane %v939_v6, 7  ;;  %v669_v42 = vsel %vm640_vm5, %v608_v39, %v610_v1  ;;  %v836_v32 = vsel %vm4084_vm6, %v1975_v21, 0.0  ;;  %1207 = vmatpush.msra.mxu1 %v1139_v50  ;;  %v842_v51 = vadd.f32 %v838_v20, %v707_v49 }
 0x14f   : > { %v703_v25 = vsel %vm640_vm5, %v4083_v43, %v576_v31  ;;  %v739_v60 = vadd.f32 %v669_v42, %v475_v36  ;;  %v4085_v34 = vrot.slane %v2349_v8, 7  ;;  %v473_v15 = vsel %vm402_vm9, %v1965_v16, 0.0 }
 0x150   : > { %v1071_v4 = vsel %vm640_vm5, %v1003_v3, %v1005_v52  ;;  %v705_v0 = vadd.f32 %v703_v25, %v441_v56  ;;  %v4086_v57 = vrot.slane %v2269_v13, 7  ;;  %v804_v62 = vsel %vm4087_vm12, %v1975_v21, 0.0 }
 0x151   : > { %v1041_v63 = vsel %vm640_vm5, %v4085_v34, %v1035_v10  ;;  %v1105_v8 = vadd.f32 %v1039_v18, %v842_v51  ;;  %v874_v37 = vadd.f32 %v806_v48, %v739_v60  ;;  %v4088_v11 = vrot.slane %v2287_v38, 7 }
 0x152   : > { %v671_v29 = vsel %vm640_vm5, %v4086_v57, %v608_v39  ;;  %v840_v12 = vadd.f32 %v836_v32, %v705_v0 }
 0x153   : > { %v737_v40 = vadd.f32 %v671_v29, %v473_v15  ;;  %v1073_v16 = vsel %vm640_vm5, %v4088_v11, %v1003_v3  ;;  %1188 = vmatpush.msra.mxu0 %v1105_v8  ;;  %v1137_v13 = vadd.f32 %v1071_v4, %v874_v37  ;;  %vm1257_vm5 = vcmask 1043456  }
 0x154   : > { %v1103_v5 = vadd.f32 %v1041_v63, %v840_v12 }
 0x155   : > { %v872_v19 = vadd.f32 %v804_v62, %v737_v40  ;;  %1208 = vmatpush.msra.mxu1 %v1137_v13 }
 0x156   : > { %1189 = vmatpush.msra.mxu0 %v1103_v5 }
 0x157   : > { %v1135_v23 = vadd.f32 %v1073_v16, %v872_v19  ;;  %1190 = vmatmul.f32.vlgmr.msra.gmra.mxu0 %v3798_v14 }
 0x159   : > { %1209 = vmatpush.msra.mxu1 %v1135_v23 }
 0x15a   : > { %1210 = vmatmul.f32.vlgmr.msra.gmra.mxu1 %v3810_v35 }
 0x1c4   : > { %v1231_v53 = vpop.f32.mrf.mxu2 }
 0x1c6   : > { %v1251_v21 = vpop.f32.mrf.mxu3 }
 0x1c7   : > { %v1252_v44 = vadd.f32 %v1251_v21, %v1231_v53 }
 0x1c9   : > { %v1256_v38 = vrot.slane %v1252_v44, 4 }
 0x1d4   : > { %v1191_v24 = vpop.f32.mrf.mxu0 }
 0x1d7   : > { %v1211_v14 = vpop.f32.mrf.mxu1 }
 0x1d8   : > { %v1212_v33 = vadd.f32 %v1211_v14, %v1191_v24 }
 0x1da   : > { %v1258_v35 = vsel %vm1257_vm5, %v1212_v33, %v1256_v38 }
 0x1db   : > { %1260 = vst [vmem:[%s229_s7] sm:$0xff] %v1258_v35 }
 0x1dc   : > { %1631 = shalt.err (!%p1628_p4)
}
 0x1dd   : > { %1412 = dma.vmem_to_hbm [thread:$0]  (%p1821_p7), %s1278_s22, 128, %s1280_s10, %s1262_s20  }
 0x1de PF: > { %s4089_s11 = sld [smem:[#allocation20_spill]]  ;;  %s1291_s17 = sand.u32 1, %s1684_s0  }
 0x1df   : > { %s1292_s12 = scalar_lea.sflag [#allocation8], %s1291_s17 }
 0x1e4   : > { %p4090_p5 = scmp.ge.s32.totalorder %s4089_s11, 2 }
 0x1e6   : > { %p1425_p6 = pnand %p4090_p5, %p1826_p9 }
 0x1e8   : > { %p1426_p8 = pneg %p1425_p6 }
 0x1ea   : > { %1679 = dma.done.wait (%p1426_p8), %s1292_s12, 128  }
 0x1eb   : > { %1681 = vsyncadd (%p1426_p8), %s1292_s12, 4294967168  ;;  %s40_s10 = sadd.s32 1, %s4089_s11   ;;  %s4091_s28 = sld [smem:[#allocation18_spill]] }
 0x1ec   : > { %p37_p10 = scmp.ge.s32.totalorder %s40_s10, 4   ;;  %s4092_s30 = sld [smem:[#allocation22_spill]] }
 0x1ed   : > { %s4093_s15 = sld [smem:[#allocation19_spill]]  ;;  %s4096_s0 = smov %s1688_s1 }
 0x1ee   : > { %s4094_s7 = sld [smem:[#allocation23_spill]]  ;;  %s4098_s6 = smov %s1700_s2 }
 0x1ef   : > { %s4095_s14 = sld [smem:[#allocation21_spill]]  ;;  %s4100_s8 = smov %s1712_s9 }
 0x1f1   : > { %s4097_s1 = smov %s4091_s28  ;;  %39 = sbr.rel (!%p37_p10) target bundleno = 19 (0x13), region = 79 }
 0x1f3   : > { %s4099_s2 = smov %s4093_s15 }
 0x1f5   : > { %s4101_s9 = smov %s4095_s14 }
 0x1f6   :  { %1298 = vsyncpa [#allocation7], 1 }
 0x1f7   :  { %1300 = vsyncpa [#allocation7 + $0x1], 1 }
 0x1f8   :  { %1301 = vsyncpa [#allocation10], 1 }
 0x1f9   :  { %1303 = vsyncpa [#allocation10 + $0x1], 1 }
 0x1fa   :  { %1304 = vsyncpa [#allocation8], 1 }
 0x1fb   :  { %1306 = vsyncpa [#allocation8 + $0x1], 1 }

</bundles_post_ra>
